<compile_context>
chip_gen: v7x
topology: tpu7x:2x2x1
jax: 0.10.0
libtpu: 0.0.40
codegen_flags: <defaults>
</compile_context>

<pallas_src>
import jax
import jax.numpy as jnp
from jax import lax
from jax.experimental import pallas as pl
from jax.experimental.pallas import tpu as pltpu

_BN_EPS = 1e-5
_LEAKY_SLOPE = 0.2
_TB = 8          # batch rows per grid step (multiple of 8 -> sublane-dense blocks)


# --------------------------------------------------------------------------- #
# In-kernel helpers
# --------------------------------------------------------------------------- #
def _conv_stage(h_cat2, w_ref, scale_ref, shift_ref, tb, lc, act_dtype):
    """(tb*lc, 3*Cin) im2col slab -> pooled (tb, lc//2, Cout) in act_dtype."""
    cout = w_ref.shape[1]
    z = jnp.dot(h_cat2, w_ref[...], preferred_element_type=jnp.float32)
    z = z.reshape(tb, lc, cout)
    z = z * scale_ref[...] + shift_ref[...]          # folded conv-bias + BatchNorm
    z = jnp.where(z > 0, z, _LEAKY_SLOPE * z)        # LeakyReLU(0.2)
    z = z.reshape(tb, lc // 2, 2, cout)              # MaxPool1d(2, 2)
    return jnp.maximum(z[:, :, 0, :], z[:, :, 1, :]).astype(act_dtype)


def _im2col(h):
    """(tb, lc, C) -> (tb*lc, 3*C): [h[t-1], h[t], h[t+1]] with zero padding."""
    tb, lc, c = h.shape
    zero = jnp.zeros((tb, 1, c), h.dtype)
    h_prev = jnp.concatenate([zero, h[:, :-1, :]], axis=1)   # h[t-1]
    h_next = jnp.concatenate([h[:, 1:, :], zero], axis=1)    # h[t+1]
    return jnp.concatenate([h_prev, h, h_next], axis=-1).reshape(tb * lc, 3 * c)


def _temporal_cnn_kernel(
    xcat_ref,
    w1_ref, s1_ref, t1_ref,
    w2_ref, s2_ref, t2_ref,
    w3_ref, s3_ref, t3_ref,
    wf1_ref, bf1_ref,
    wf2_ref, bf2_ref,
    wf3_ref, bf3_ref,
    o_ref,
):
    act = xcat_ref.dtype
    tb, L, k1 = xcat_ref.shape

    # Stage 1: im2col was built host-side -> single K=3*Cin matmul.
    h = _conv_stage(xcat_ref[...].reshape(tb * L, k1),
                    w1_ref, s1_ref, t1_ref, tb, L, act)              # (tb, L/2, F1)
    # Stages 2/3: shift the small act-dtype slab in-kernel, one matmul each.
    h = _conv_stage(_im2col(h), w2_ref, s2_ref, t2_ref, tb, L // 2, act)
    h = _conv_stage(_im2col(h), w3_ref, s3_ref, t3_ref, tb, L // 4, act)

    # AdaptiveAvgPool1d(1) + flatten (mean accumulated in f32).
    feat = jnp.mean(h.astype(jnp.float32), axis=1)                   # (tb, F3)

    # MLP head.
    f = jnp.dot(feat.astype(act), wf1_ref[...],
                preferred_element_type=jnp.float32) + bf1_ref[...]
    f = jnp.maximum(f, 0.0)
    f = jnp.dot(f.astype(act), wf2_ref[...],
                preferred_element_type=jnp.float32) + bf2_ref[...]
    f = jnp.maximum(f, 0.0)
    # TODO(synk): Dropout(0.3) is identity at inference; training-mode random
    # masking is not implemented in-kernel.
    logits = jnp.dot(f.astype(act), wf3_ref[...],
                     preferred_element_type=jnp.float32) + bf3_ref[...]
    o_ref[...] = logits.astype(o_ref.dtype)


# --------------------------------------------------------------------------- #
# Host wrapper
# --------------------------------------------------------------------------- #
def _round_up(v, m):
    return -(-v // m) * m


def _padded_bytes(shape, dtype):
    """Approx VMEM footprint of one buffer, (8,128)-tile padded."""
    itemsize = jnp.dtype(dtype).itemsize
    if len(shape) == 1:
        return _round_up(shape[0], 128) * 8 * itemsize
    lead = 1
    for d in shape[:-2]:
        lead *= d
    return lead * _round_up(shape[-2], 8) * _round_up(shape[-1], 128) * itemsize


def temporal_cnn_forward(x, params):
    """x: (B, 1, Cin, L) like the PyTorch module. Returns (B, num_classes) f32."""
    x_sq = jnp.squeeze(x, axis=1)                   # matches `x = x.squeeze(1)`
    B, Cin, L = x_sq.shape
    assert L % 8 == 0, "three stride-2 max-pools require L % 8 == 0"
    act = x_sq.dtype

    # ---- host-side stage-1 im2col (channels-last, 3x lane-denser than raw x) --
    # TODO(synk): with Cin=4 the 3*Cin=12-channel slab is still lane-sparse
    # (padded to 128 lanes in VMEM); for big B*L pre-pack into a 128-lane slab.
    x_l = jnp.transpose(x_sq, (0, 2, 1))            # (B, L, Cin)
    zrow = jnp.zeros((B, 1, Cin), act)
    x_cat = jnp.concatenate(
        [jnp.concatenate([zrow, x_l[:, :-1, :]], axis=1),   # x[t-1]  (tap 0)
         x_l,                                                # x[t]    (tap 1)
         jnp.concatenate([x_l[:, 1:, :], zrow], axis=1)],    # x[t+1]  (tap 2)
        axis=-1)                                     # (B, L, 3*Cin)

    # ---- batch tiling: pad B to a multiple of TB ------------------------------
    TB = _TB
    B_pad = _round_up(B, TB)
    if B_pad != B:
        x_cat = jnp.concatenate(
            [x_cat, jnp.zeros((B_pad - B, L, 3 * Cin), act)], axis=0)

    # ---- fold parameters into kernel-friendly layouts -------------------------
    # TODO(synk): BatchNorm1d is eval-mode (running stats folded into
    # scale/shift); training-mode batch statistics are not computed here.
    def conv_stage_params(Wc, bc, gamma, beta, mean, var):
        cout, cin, k = Wc.shape
        w_packed = jnp.transpose(Wc, (2, 1, 0)).reshape(k * cin, cout).astype(act)
        scale = (gamma / jnp.sqrt(var + _BN_EPS)).astype(jnp.float32)
        shift = ((bc - mean) * scale + beta).astype(jnp.float32)
        return w_packed, scale.reshape(1, cout), shift.reshape(1, cout)

    w1, s1, t1 = conv_stage_params(params["W1"], params["b1"], params["g1"],
                                   params["be1"], params["m1"], params["v1"])
    w2, s2, t2 = conv_stage_params(params["W2"], params["b2"], params["g2"],
                                   params["be2"], params["m2"], params["v2"])
    w3, s3, t3 = conv_stage_params(params["W3"], params["b3"], params["g3"],
                                   params["be3"], params["m3"], params["v3"])

    wf1 = params["Wf1"].T.astype(act)
    bf1 = params["bf1"].reshape(1, -1).astype(jnp.float32)
    wf2 = params["Wf2"].T.astype(act)
    bf2 = params["bf2"].reshape(1, -1).astype(jnp.float32)

    NC, H2 = params["Wf3"].shape
    NC_pad = _round_up(NC, 128)                      # lane-dense final matmul + store
    wf3 = jnp.zeros((H2, NC_pad), act).at[:, :NC].set(params["Wf3"].T.astype(act))
    bf3 = jnp.zeros((1, NC_pad), jnp.float32).at[:, :NC].set(
        params["bf3"].astype(jnp.float32))

    F1, F2, F3 = w1.shape[1], w2.shape[1], w3.shape[1]
    H1 = wf1.shape[1]
    K1 = 3 * Cin

    # ---- grid / specs ----------------------------------------------------------
    grid = (B_pad // TB,)

    def full(shape):
        nd = len(shape)
        return pl.BlockSpec(shape, lambda b, _nd=nd: (0,) * _nd)

    in_specs = [
        pl.BlockSpec((TB, L, K1), lambda b: (b, 0, 0)),        # stage-1 im2col slab
        full(w1.shape), full(s1.shape), full(t1.shape),
        full(w2.shape), full(s2.shape), full(t2.shape),
        full(w3.shape), full(s3.shape), full(t3.shape),
        full(wf1.shape), full(bf1.shape),
        full(wf2.shape), full(bf2.shape),
        full(wf3.shape), full(bf3.shape),
    ]

    # ---- explicit VMEM budget (with headroom) ----------------------------------
    weights = [w1, s1, t1, w2, s2, t2, w3, s3, t3, wf1, bf1, wf2, bf2, wf3, bf3]
    est = 2 * _padded_bytes((TB, L, K1), act)                   # double-buffered x
    est += sum(2 * _padded_bytes(w.shape, w.dtype) for w in weights)
    est += 2 * _padded_bytes((TB, NC_pad), jnp.float32)         # output block
    stage_dims = [(L, Cin, F1), (L // 2, F1, F2), (L // 4, F2, F3)]
    for lc, ci, co in stage_dims:
        est += _padded_bytes((TB, lc, 3 * ci), act)             # im2col slab
        est += 2 * _padded_bytes((TB, lc, co), jnp.float32)     # conv out + epilogue
    vmem_limit = int(min(max(2 * est, 32 * 1024 * 1024), 48 * 1024 * 1024))

    # ---- cost estimate ----------------------------------------------------------
    flops = 0
    for lc, ci, co in stage_dims:
        flops += 2 * B_pad * lc * (3 * ci) * co
    flops += 2 * B_pad * (F3 * H1 + H1 * H2 + H2 * NC_pad)
    bytes_accessed = int(
        x_cat.size * jnp.dtype(act).itemsize
        + sum(w.size * jnp.dtype(w.dtype).itemsize for w in weights)
        + B_pad * NC_pad * 4)
    cost = pl.CostEstimate(flops=int(flops), transcendentals=0,
                           bytes_accessed=bytes_accessed)

    out = pl.pallas_call(
        _temporal_cnn_kernel,
        out_shape=jax.ShapeDtypeStruct((B_pad, NC_pad), jnp.float32),
        grid_spec=pltpu.PrefetchScalarGridSpec(
            num_scalar_prefetch=0,
            grid=grid,
            in_specs=in_specs,
            out_specs=pl.BlockSpec((TB, NC_pad), lambda b: (b, 0)),
        ),
        compiler_params=pltpu.CompilerParams(
            dimension_semantics=("parallel",),      # shards across TCs on v7x
            vmem_limit_bytes=vmem_limit,
        ),
        cost_estimate=cost,
    )(x_cat, w1, s1, t1, w2, s2, t2, w3, s3, t3, wf1, bf1, wf2, bf2, wf3, bf3)

    return out[:B, :NC]


# --------------------------------------------------------------------------- #
# Pure-JAX reference (PyTorch forward, eval mode)
# --------------------------------------------------------------------------- #
def temporal_cnn_ref(x, params):
    h = jnp.squeeze(x, axis=1)  # (B, Cin, L)

    def stage(h, Wc, bc, gamma, beta, mean, var):
        y = lax.conv_general_dilated(
            h, Wc, window_strides=(1,), padding=[(1, 1)],
            dimension_numbers=("NCH", "OIH", "NCH"),
            precision=lax.Precision.HIGHEST)
        y = y + bc[None, :, None]
        y = (y - mean[None, :, None]) / jnp.sqrt(var[None, :, None] + _BN_EPS)
        y = y * gamma[None, :, None] + beta[None, :, None]
        y = jnp.where(y > 0, y, _LEAKY_SLOPE * y)
        y = lax.reduce_window(y, -jnp.inf, lax.max,
                              window_dimensions=(1, 1, 2),
                              window_strides=(1, 1, 2), padding="VALID")
        return y

    h = stage(h, params["W1"], params["b1"], params["g1"],
              params["be1"], params["m1"], params["v1"])
    h = stage(h, params["W2"], params["b2"], params["g2"],
              params["be2"], params["m2"], params["v2"])
    h = stage(h, params["W3"], params["b3"], params["g3"],
              params["be3"], params["m3"], params["v3"])
    h = jnp.mean(h, axis=2)                                   # AdaptiveAvgPool1d(1)
    h = jnp.maximum(jnp.dot(h, params["Wf1"].T, precision=lax.Precision.HIGHEST)
                    + params["bf1"], 0.0)
    h = jnp.maximum(jnp.dot(h, params["Wf2"].T, precision=lax.Precision.HIGHEST)
                    + params["bf2"], 0.0)
    # Dropout(0.3) is identity at inference.
    return jnp.dot(h, params["Wf3"].T, precision=lax.Precision.HIGHEST) + params["bf3"]


if __name__ == "__main__":
    B, Cin, L = 2, 4, 16
    num_filters, num_classes = 32, 10
    F1, F2, F3 = num_filters, num_filters * 2, num_filters * 4

    key = jax.random.PRNGKey(0)
    keys = jax.random.split(key, 32)
    ki = iter(keys)

    def nrm(shape, scale=1.0):
        return jax.random.normal(next(ki), shape, dtype=jnp.float32) * scale

    def uni(shape):
        return jax.random.uniform(next(ki), shape, minval=0.5, maxval=1.5,
                                  dtype=jnp.float32)

    x = nrm((B, 1, Cin, L))

    params = {
        "W1": nrm((F1, Cin, 3), (Cin * 3) ** -0.5), "b1": nrm((F1,), 0.1),
        "g1": 1.0 + nrm((F1,), 0.1), "be1": nrm((F1,), 0.1),
        "m1": nrm((F1,), 0.1), "v1": uni((F1,)),

        "W2": nrm((F2, F1, 3), (F1 * 3) ** -0.5), "b2": nrm((F2,), 0.1),
        "g2": 1.0 + nrm((F2,), 0.1), "be2": nrm((F2,), 0.1),
        "m2": nrm((F2,), 0.1), "v2": uni((F2,)),

        "W3": nrm((F3, F2, 3), (F2 * 3) ** -0.5), "b3": nrm((F3,), 0.1),
        "g3": 1.0 + nrm((F3,), 0.1), "be3": nrm((F3,), 0.1),
        "m3": nrm((F3,), 0.1), "v3": uni((F3,)),

        "Wf1": nrm((256, F3), F3 ** -0.5), "bf1": nrm((256,), 0.1),
        "Wf2": nrm((128, 256), 256 ** -0.5), "bf2": nrm((128,), 0.1),
        "Wf3": nrm((num_classes, 128), 128 ** -0.5), "bf3": nrm((num_classes,), 0.1),
    }

    out = temporal_cnn_forward(x, params)
    out = jax.block_until_ready(out)

    ref = temporal_cnn_ref(x, params)
    assert out.shape == (B, num_classes)
    err = jnp.max(jnp.abs(out - ref))
    assert jnp.allclose(out, ref, rtol=1e-3, atol=1e-3), f"mismatch vs reference: {err}"

    print("KERNEL_OK")
</pallas_src>

<mosaic_0001>
module attributes {stable_mosaic.version = 11 : i64} {
  func.func @_temporal_cnn_kernel(%arg0: i32, %arg1: memref<8x16x12xf32, #tpu.memory_space<vmem>>, %arg2: memref<12x32xf32, #tpu.memory_space<vmem>>, %arg3: memref<1x32xf32, #tpu.memory_space<vmem>>, %arg4: memref<1x32xf32, #tpu.memory_space<vmem>>, %arg5: memref<96x64xf32, #tpu.memory_space<vmem>>, %arg6: memref<1x64xf32, #tpu.memory_space<vmem>>, %arg7: memref<1x64xf32, #tpu.memory_space<vmem>>, %arg8: memref<192x128xf32, #tpu.memory_space<vmem>>, %arg9: memref<1x128xf32, #tpu.memory_space<vmem>>, %arg10: memref<1x128xf32, #tpu.memory_space<vmem>>, %arg11: memref<128x256xf32, #tpu.memory_space<vmem>>, %arg12: memref<1x256xf32, #tpu.memory_space<vmem>>, %arg13: memref<256x128xf32, #tpu.memory_space<vmem>>, %arg14: memref<1x128xf32, #tpu.memory_space<vmem>>, %arg15: memref<128x128xf32, #tpu.memory_space<vmem>>, %arg16: memref<1x128xf32, #tpu.memory_space<vmem>>, %arg17: memref<8x128xf32, #tpu.memory_space<vmem>>) attributes {dimension_semantics = [#tpu.dimension_semantics<parallel>], iteration_bounds = array<i64: 1>, scalar_prefetch = 0 : i64, scratch_operands = 0 : i64, tpu.core_type = #tpu.core_type<tc>, window_params = [{transform_indices = @transform_0, window_bounds = array<i64: 8, 16, 12>}, {pipeline_mode = #tpu.pipeline_mode<synchronous>, transform_indices = @transform_1, window_bounds = array<i64: 12, 32>}, {pipeline_mode = #tpu.pipeline_mode<synchronous>, transform_indices = @transform_2, window_bounds = array<i64: 1, 32>}, {pipeline_mode = #tpu.pipeline_mode<synchronous>, transform_indices = @transform_3, window_bounds = array<i64: 1, 32>}, {pipeline_mode = #tpu.pipeline_mode<synchronous>, transform_indices = @transform_4, window_bounds = array<i64: 96, 64>}, {pipeline_mode = #tpu.pipeline_mode<synchronous>, transform_indices = @transform_5, window_bounds = array<i64: 1, 64>}, {pipeline_mode = #tpu.pipeline_mode<synchronous>, transform_indices = @transform_6, window_bounds = array<i64: 1, 64>}, {pipeline_mode = #tpu.pipeline_mode<synchronous>, transform_indices = @transform_7, window_bounds = array<i64: 192, 128>}, {pipeline_mode = #tpu.pipeline_mode<synchronous>, transform_indices = @transform_8, window_bounds = array<i64: 1, 128>}, {pipeline_mode = #tpu.pipeline_mode<synchronous>, transform_indices = @transform_9, window_bounds = array<i64: 1, 128>}, {pipeline_mode = #tpu.pipeline_mode<synchronous>, transform_indices = @transform_10, window_bounds = array<i64: 128, 256>}, {pipeline_mode = #tpu.pipeline_mode<synchronous>, transform_indices = @transform_11, window_bounds = array<i64: 1, 256>}, {pipeline_mode = #tpu.pipeline_mode<synchronous>, transform_indices = @transform_12, window_bounds = array<i64: 256, 128>}, {pipeline_mode = #tpu.pipeline_mode<synchronous>, transform_indices = @transform_13, window_bounds = array<i64: 1, 128>}, {pipeline_mode = #tpu.pipeline_mode<synchronous>, transform_indices = @transform_14, window_bounds = array<i64: 128, 128>}, {pipeline_mode = #tpu.pipeline_mode<synchronous>, transform_indices = @transform_15, window_bounds = array<i64: 1, 128>}, {transform_indices = @transform_16, window_bounds = array<i64: 8, 128>}]} {
    %c0 = arith.constant 0 : index
    %c0_0 = arith.constant 0 : index
    %c0_1 = arith.constant 0 : index
    %0 = vector.load %arg1[%c0, %c0_0, %c0_1] : memref<8x16x12xf32, #tpu.memory_space<vmem>>, vector<8x16x12xf32>
    %1 = vector.shape_cast %0 : vector<8x16x12xf32> to vector<128x12xf32>
    %c0_2 = arith.constant 0 : index
    %c0_3 = arith.constant 0 : index
    %2 = vector.load %arg2[%c0_2, %c0_3] : memref<12x32xf32, #tpu.memory_space<vmem>>, vector<12x32xf32>
    %cst = arith.constant dense<0.000000e+00> : vector<128x32xf32>
    %3 = tpu.matmul %1, %2, %cst {dimension_numbers = #tpu.dot_dimension_numbers<[1], [0], [0], [1], [0, 0, 1, 1], [], []>} : vector<128x12xf32>, vector<12x32xf32>, vector<128x32xf32> -> vector<128x32xf32>
    %4 = vector.shape_cast %3 : vector<128x32xf32> to vector<8x16x32xf32>
    %c0_4 = arith.constant 0 : index
    %c0_5 = arith.constant 0 : index
    %5 = vector.load %arg3[%c0_4, %c0_5] : memref<1x32xf32, #tpu.memory_space<vmem>>, vector<1x32xf32>
    %6 = vector.shape_cast %5 : vector<1x32xf32> to vector<1x1x32xf32>
    %7 = vector.broadcast %6 : vector<1x1x32xf32> to vector<8x16x32xf32>
    %8 = arith.mulf %4, %7 : vector<8x16x32xf32>
    %c0_6 = arith.constant 0 : index
    %c0_7 = arith.constant 0 : index
    %9 = vector.load %arg4[%c0_6, %c0_7] : memref<1x32xf32, #tpu.memory_space<vmem>>, vector<1x32xf32>
    %10 = vector.shape_cast %9 : vector<1x32xf32> to vector<1x1x32xf32>
    %11 = vector.broadcast %10 : vector<1x1x32xf32> to vector<8x16x32xf32>
    %12 = arith.addf %8, %11 : vector<8x16x32xf32>
    %cst_8 = arith.constant 0.000000e+00 : f32
    %13 = vector.broadcast %cst_8 : f32 to vector<8x16x32xf32>
    %14 = arith.cmpf ogt, %12, %13 : vector<8x16x32xf32>
    %cst_9 = arith.constant 2.000000e-01 : f32
    %15 = vector.broadcast %cst_9 : f32 to vector<8x16x32xf32>
    %16 = arith.mulf %15, %12 : vector<8x16x32xf32>
    %17 = arith.select %14, %12, %16 : vector<8x16x32xi1>, vector<8x16x32xf32>
    %18 = vector.shape_cast %17 : vector<8x16x32xf32> to vector<8x8x2x32xf32>
    %19 = vector.extract_strided_slice %18 {offsets = [0, 0, 0, 0], sizes = [8, 8, 1, 32], strides = [1, 1, 1, 1]} : vector<8x8x2x32xf32> to vector<8x8x1x32xf32>
    %20 = vector.shape_cast %19 : vector<8x8x1x32xf32> to vector<8x8x32xf32>
    %21 = vector.extract_strided_slice %18 {offsets = [0, 0, 1, 0], sizes = [8, 8, 1, 32], strides = [1, 1, 1, 1]} : vector<8x8x2x32xf32> to vector<8x8x1x32xf32>
    %22 = vector.shape_cast %21 : vector<8x8x1x32xf32> to vector<8x8x32xf32>
    %23 = arith.maximumf %20, %22 : vector<8x8x32xf32>
    %cst_10 = arith.constant 0.000000e+00 : f32
    %24 = vector.broadcast %cst_10 : f32 to vector<8x1x32xf32>
    %25 = vector.extract_strided_slice %23 {offsets = [0, 0, 0], sizes = [8, 7, 32], strides = [1, 1, 1]} : vector<8x8x32xf32> to vector<8x7x32xf32>
    %26 = tpu.concatenate %24, %25 in 1 : vector<8x1x32xf32>, vector<8x7x32xf32> -> vector<8x8x32xf32>
    %27 = vector.extract_strided_slice %23 {offsets = [0, 1, 0], sizes = [8, 7, 32], strides = [1, 1, 1]} : vector<8x8x32xf32> to vector<8x7x32xf32>
    %28 = tpu.concatenate %27, %24 in 1 : vector<8x7x32xf32>, vector<8x1x32xf32> -> vector<8x8x32xf32>
    %29 = tpu.concatenate %26, %23, %28 in 2 : vector<8x8x32xf32>, vector<8x8x32xf32>, vector<8x8x32xf32> -> vector<8x8x96xf32>
    %30 = vector.shape_cast %29 : vector<8x8x96xf32> to vector<64x96xf32>
    %c0_11 = arith.constant 0 : index
    %c0_12 = arith.constant 0 : index
    %31 = vector.load %arg5[%c0_11, %c0_12] : memref<96x64xf32, #tpu.memory_space<vmem>>, vector<96x64xf32>
    %cst_13 = arith.constant dense<0.000000e+00> : vector<64x64xf32>
    %32 = tpu.matmul %30, %31, %cst_13 {dimension_numbers = #tpu.dot_dimension_numbers<[1], [0], [0], [1], [0, 0, 1, 1], [], []>} : vector<64x96xf32>, vector<96x64xf32>, vector<64x64xf32> -> vector<64x64xf32>
    %33 = vector.shape_cast %32 : vector<64x64xf32> to vector<8x8x64xf32>
    %c0_14 = arith.constant 0 : index
    %c0_15 = arith.constant 0 : index
    %34 = vector.load %arg6[%c0_14, %c0_15] : memref<1x64xf32, #tpu.memory_space<vmem>>, vector<1x64xf32>
    %35 = vector.shape_cast %34 : vector<1x64xf32> to vector<1x1x64xf32>
    %36 = vector.broadcast %35 : vector<1x1x64xf32> to vector<8x8x64xf32>
    %37 = arith.mulf %33, %36 : vector<8x8x64xf32>
    %c0_16 = arith.constant 0 : index
    %c0_17 = arith.constant 0 : index
    %38 = vector.load %arg7[%c0_16, %c0_17] : memref<1x64xf32, #tpu.memory_space<vmem>>, vector<1x64xf32>
    %39 = vector.shape_cast %38 : vector<1x64xf32> to vector<1x1x64xf32>
    %40 = vector.broadcast %39 : vector<1x1x64xf32> to vector<8x8x64xf32>
    %41 = arith.addf %37, %40 : vector<8x8x64xf32>
    %cst_18 = arith.constant 0.000000e+00 : f32
    %42 = vector.broadcast %cst_18 : f32 to vector<8x8x64xf32>
    %43 = arith.cmpf ogt, %41, %42 : vector<8x8x64xf32>
    %cst_19 = arith.constant 2.000000e-01 : f32
    %44 = vector.broadcast %cst_19 : f32 to vector<8x8x64xf32>
    %45 = arith.mulf %44, %41 : vector<8x8x64xf32>
    %46 = arith.select %43, %41, %45 : vector<8x8x64xi1>, vector<8x8x64xf32>
    %47 = vector.shape_cast %46 : vector<8x8x64xf32> to vector<8x4x2x64xf32>
    %48 = vector.extract_strided_slice %47 {offsets = [0, 0, 0, 0], sizes = [8, 4, 1, 64], strides = [1, 1, 1, 1]} : vector<8x4x2x64xf32> to vector<8x4x1x64xf32>
    %49 = vector.shape_cast %48 : vector<8x4x1x64xf32> to vector<8x4x64xf32>
    %50 = vector.extract_strided_slice %47 {offsets = [0, 0, 1, 0], sizes = [8, 4, 1, 64], strides = [1, 1, 1, 1]} : vector<8x4x2x64xf32> to vector<8x4x1x64xf32>
    %51 = vector.shape_cast %50 : vector<8x4x1x64xf32> to vector<8x4x64xf32>
    %52 = arith.maximumf %49, %51 : vector<8x4x64xf32>
    %cst_20 = arith.constant 0.000000e+00 : f32
    %53 = vector.broadcast %cst_20 : f32 to vector<8x1x64xf32>
    %54 = vector.extract_strided_slice %52 {offsets = [0, 0, 0], sizes = [8, 3, 64], strides = [1, 1, 1]} : vector<8x4x64xf32> to vector<8x3x64xf32>
    %55 = tpu.concatenate %53, %54 in 1 : vector<8x1x64xf32>, vector<8x3x64xf32> -> vector<8x4x64xf32>
    %56 = vector.extract_strided_slice %52 {offsets = [0, 1, 0], sizes = [8, 3, 64], strides = [1, 1, 1]} : vector<8x4x64xf32> to vector<8x3x64xf32>
    %57 = tpu.concatenate %56, %53 in 1 : vector<8x3x64xf32>, vector<8x1x64xf32> -> vector<8x4x64xf32>
    %58 = tpu.concatenate %55, %52, %57 in 2 : vector<8x4x64xf32>, vector<8x4x64xf32>, vector<8x4x64xf32> -> vector<8x4x192xf32>
    %59 = vector.shape_cast %58 : vector<8x4x192xf32> to vector<32x192xf32>
    %c0_21 = arith.constant 0 : index
    %c0_22 = arith.constant 0 : index
    %60 = vector.load %arg8[%c0_21, %c0_22] : memref<192x128xf32, #tpu.memory_space<vmem>>, vector<192x128xf32>
    %cst_23 = arith.constant dense<0.000000e+00> : vector<32x128xf32>
    %61 = tpu.matmul %59, %60, %cst_23 {dimension_numbers = #tpu.dot_dimension_numbers<[1], [0], [0], [1], [0, 0, 1, 1], [], []>} : vector<32x192xf32>, vector<192x128xf32>, vector<32x128xf32> -> vector<32x128xf32>
    %62 = vector.shape_cast %61 : vector<32x128xf32> to vector<8x4x128xf32>
    %c0_24 = arith.constant 0 : index
    %c0_25 = arith.constant 0 : index
    %63 = vector.load %arg9[%c0_24, %c0_25] : memref<1x128xf32, #tpu.memory_space<vmem>>, vector<1x128xf32>
    %64 = vector.shape_cast %63 : vector<1x128xf32> to vector<1x1x128xf32>
    %65 = vector.broadcast %64 : vector<1x1x128xf32> to vector<8x4x128xf32>
    %66 = arith.mulf %62, %65 : vector<8x4x128xf32>
    %c0_26 = arith.constant 0 : index
    %c0_27 = arith.constant 0 : index
    %67 = vector.load %arg10[%c0_26, %c0_27] : memref<1x128xf32, #tpu.memory_space<vmem>>, vector<1x128xf32>
    %68 = vector.shape_cast %67 : vector<1x128xf32> to vector<1x1x128xf32>
    %69 = vector.broadcast %68 : vector<1x1x128xf32> to vector<8x4x128xf32>
    %70 = arith.addf %66, %69 : vector<8x4x128xf32>
    %cst_28 = arith.constant 0.000000e+00 : f32
    %71 = vector.broadcast %cst_28 : f32 to vector<8x4x128xf32>
    %72 = arith.cmpf ogt, %70, %71 : vector<8x4x128xf32>
    %cst_29 = arith.constant 2.000000e-01 : f32
    %73 = vector.broadcast %cst_29 : f32 to vector<8x4x128xf32>
    %74 = arith.mulf %73, %70 : vector<8x4x128xf32>
    %75 = arith.select %72, %70, %74 : vector<8x4x128xi1>, vector<8x4x128xf32>
    %76 = vector.shape_cast %75 : vector<8x4x128xf32> to vector<8x2x2x128xf32>
    %77 = vector.extract_strided_slice %76 {offsets = [0, 0, 0, 0], sizes = [8, 2, 1, 128], strides = [1, 1, 1, 1]} : vector<8x2x2x128xf32> to vector<8x2x1x128xf32>
    %78 = vector.shape_cast %77 : vector<8x2x1x128xf32> to vector<8x2x128xf32>
    %79 = vector.extract_strided_slice %76 {offsets = [0, 0, 1, 0], sizes = [8, 2, 1, 128], strides = [1, 1, 1, 1]} : vector<8x2x2x128xf32> to vector<8x2x1x128xf32>
    %80 = vector.shape_cast %79 : vector<8x2x1x128xf32> to vector<8x2x128xf32>
    %81 = arith.maximumf %78, %80 : vector<8x2x128xf32>
    %cst_30 = arith.constant dense<0.000000e+00> : vector<8x128xf32>
    %82 = vector.multi_reduction <add>, %81, %cst_30 [1] : vector<8x2x128xf32> to vector<8x128xf32>
    %cst_31 = arith.constant 2.000000e+00 : f32
    %83 = vector.broadcast %cst_31 : f32 to vector<8x128xf32>
    %84 = arith.divf %82, %83 : vector<8x128xf32>
    %c0_32 = arith.constant 0 : index
    %c0_33 = arith.constant 0 : index
    %85 = vector.load %arg11[%c0_32, %c0_33] : memref<128x256xf32, #tpu.memory_space<vmem>>, vector<128x256xf32>
    %cst_34 = arith.constant dense<0.000000e+00> : vector<8x256xf32>
    %86 = tpu.matmul %84, %85, %cst_34 {dimension_numbers = #tpu.dot_dimension_numbers<[1], [0], [0], [1], [0, 0, 1, 1], [], []>} : vector<8x128xf32>, vector<128x256xf32>, vector<8x256xf32> -> vector<8x256xf32>
    %c0_35 = arith.constant 0 : index
    %c0_36 = arith.constant 0 : index
    %87 = vector.load %arg12[%c0_35, %c0_36] : memref<1x256xf32, #tpu.memory_space<vmem>>, vector<1x256xf32>
    %88 = vector.broadcast %87 : vector<1x256xf32> to vector<8x256xf32>
    %89 = arith.addf %86, %88 : vector<8x256xf32>
    %cst_37 = arith.constant 0.000000e+00 : f32
    %90 = vector.broadcast %cst_37 : f32 to vector<8x256xf32>
    %91 = arith.maximumf %89, %90 : vector<8x256xf32>
    %c0_38 = arith.constant 0 : index
    %c0_39 = arith.constant 0 : index
    %92 = vector.load %arg13[%c0_38, %c0_39] : memref<256x128xf32, #tpu.memory_space<vmem>>, vector<256x128xf32>
    %cst_40 = arith.constant dense<0.000000e+00> : vector<8x128xf32>
    %93 = tpu.matmul %91, %92, %cst_40 {dimension_numbers = #tpu.dot_dimension_numbers<[1], [0], [0], [1], [0, 0, 1, 1], [], []>} : vector<8x256xf32>, vector<256x128xf32>, vector<8x128xf32> -> vector<8x128xf32>
    %c0_41 = arith.constant 0 : index
    %c0_42 = arith.constant 0 : index
    %94 = vector.load %arg14[%c0_41, %c0_42] : memref<1x128xf32, #tpu.memory_space<vmem>>, vector<1x128xf32>
    %95 = vector.broadcast %94 : vector<1x128xf32> to vector<8x128xf32>
    %96 = arith.addf %93, %95 : vector<8x128xf32>
    %cst_43 = arith.constant 0.000000e+00 : f32
    %97 = vector.broadcast %cst_43 : f32 to vector<8x128xf32>
    %98 = arith.maximumf %96, %97 : vector<8x128xf32>
    %c0_44 = arith.constant 0 : index
    %c0_45 = arith.constant 0 : index
    %99 = vector.load %arg15[%c0_44, %c0_45] : memref<128x128xf32, #tpu.memory_space<vmem>>, vector<128x128xf32>
    %cst_46 = arith.constant dense<0.000000e+00> : vector<8x128xf32>
    %100 = tpu.matmul %98, %99, %cst_46 {dimension_numbers = #tpu.dot_dimension_numbers<[1], [0], [0], [1], [0, 0, 1, 1], [], []>} : vector<8x128xf32>, vector<128x128xf32>, vector<8x128xf32> -> vector<8x128xf32>
    %c0_47 = arith.constant 0 : index
    %c0_48 = arith.constant 0 : index
    %101 = vector.load %arg16[%c0_47, %c0_48] : memref<1x128xf32, #tpu.memory_space<vmem>>, vector<1x128xf32>
    %102 = vector.broadcast %101 : vector<1x128xf32> to vector<8x128xf32>
    %103 = arith.addf %100, %102 : vector<8x128xf32>
    %c0_49 = arith.constant 0 : index
    %c0_50 = arith.constant 0 : index
    %104 = vector.load %arg17[%c0_49, %c0_50] : memref<8x128xf32, #tpu.memory_space<vmem>>, vector<8x128xf32>
    tpu.vector_store %arg17[%c0_49, %c0_50], %103 {strides = array<i32>} : memref<8x128xf32, #tpu.memory_space<vmem>>, vector<8x128xf32>,
    return
  }
  func.func @transform_0(%arg0: i32) -> (i32, i32, i32) {
    %c0_i32 = arith.constant 0 : i32
    %c0_i32_0 = arith.constant 0 : i32
    %c0_i32_1 = arith.constant 0 : i32
    return %arg0, %c0_i32, %c0_i32_0 : i32, i32, i32
  }
  func.func @transform_1(%arg0: i32) -> (i32, i32) {
    %c0_i32 = arith.constant 0 : i32
    %c0_i32_0 = arith.constant 0 : i32
    %c0_i32_1 = arith.constant 0 : i32
    return %c0_i32, %c0_i32_0 : i32, i32
  }
  func.func @transform_2(%arg0: i32) -> (i32, i32) {
    %c0_i32 = arith.constant 0 : i32
    %c0_i32_0 = arith.constant 0 : i32
    %c0_i32_1 = arith.constant 0 : i32
    return %c0_i32, %c0_i32_0 : i32, i32
  }
  func.func @transform_3(%arg0: i32) -> (i32, i32) {
    %c0_i32 = arith.constant 0 : i32
    %c0_i32_0 = arith.constant 0 : i32
    %c0_i32_1 = arith.constant 0 : i32
    return %c0_i32, %c0_i32_0 : i32, i32
  }
  func.func @transform_4(%arg0: i32) -> (i32, i32) {
    %c0_i32 = arith.constant 0 : i32
    %c0_i32_0 = arith.constant 0 : i32
    %c0_i32_1 = arith.constant 0 : i32
    return %c0_i32, %c0_i32_0 : i32, i32
  }
  func.func @transform_5(%arg0: i32) -> (i32, i32) {
    %c0_i32 = arith.constant 0 : i32
    %c0_i32_0 = arith.constant 0 : i32
    %c0_i32_1 = arith.constant 0 : i32
    return %c0_i32, %c0_i32_0 : i32, i32
  }
  func.func @transform_6(%arg0: i32) -> (i32, i32) {
    %c0_i32 = arith.constant 0 : i32
    %c0_i32_0 = arith.constant 0 : i32
    %c0_i32_1 = arith.constant 0 : i32
    return %c0_i32, %c0_i32_0 : i32, i32
  }
  func.func @transform_7(%arg0: i32) -> (i32, i32) {
    %c0_i32 = arith.constant 0 : i32
    %c0_i32_0 = arith.constant 0 : i32
    %c0_i32_1 = arith.constant 0 : i32
    return %c0_i32, %c0_i32_0 : i32, i32
  }
  func.func @transform_8(%arg0: i32) -> (i32, i32) {
    %c0_i32 = arith.constant 0 : i32
    %c0_i32_0 = arith.constant 0 : i32
    %c0_i32_1 = arith.constant 0 : i32
    return %c0_i32, %c0_i32_0 : i32, i32
  }
  func.func @transform_9(%arg0: i32) -> (i32, i32) {
    %c0_i32 = arith.constant 0 : i32
    %c0_i32_0 = arith.constant 0 : i32
    %c0_i32_1 = arith.constant 0 : i32
    return %c0_i32, %c0_i32_0 : i32, i32
  }
  func.func @transform_10(%arg0: i32) -> (i32, i32) {
    %c0_i32 = arith.constant 0 : i32
    %c0_i32_0 = arith.constant 0 : i32
    %c0_i32_1 = arith.constant 0 : i32
    return %c0_i32, %c0_i32_0 : i32, i32
  }
  func.func @transform_11(%arg0: i32) -> (i32, i32) {
    %c0_i32 = arith.constant 0 : i32
    %c0_i32_0 = arith.constant 0 : i32
    %c0_i32_1 = arith.constant 0 : i32
    return %c0_i32, %c0_i32_0 : i32, i32
  }
  func.func @transform_12(%arg0: i32) -> (i32, i32) {
    %c0_i32 = arith.constant 0 : i32
    %c0_i32_0 = arith.constant 0 : i32
    %c0_i32_1 = arith.constant 0 : i32
    return %c0_i32, %c0_i32_0 : i32, i32
  }
  func.func @transform_13(%arg0: i32) -> (i32, i32) {
    %c0_i32 = arith.constant 0 : i32
    %c0_i32_0 = arith.constant 0 : i32
    %c0_i32_1 = arith.constant 0 : i32
    return %c0_i32, %c0_i32_0 : i32, i32
  }
  func.func @transform_14(%arg0: i32) -> (i32, i32) {
    %c0_i32 = arith.constant 0 : i32
    %c0_i32_0 = arith.constant 0 : i32
    %c0_i32_1 = arith.constant 0 : i32
    return %c0_i32, %c0_i32_0 : i32, i32
  }
  func.func @transform_15(%arg0: i32) -> (i32, i32) {
    %c0_i32 = arith.constant 0 : i32
    %c0_i32_0 = arith.constant 0 : i32
    %c0_i32_1 = arith.constant 0 : i32
    return %c0_i32, %c0_i32_0 : i32, i32
  }
  func.func @transform_16(%arg0: i32) -> (i32, i32) {
    %c0_i32 = arith.constant 0 : i32
    %c0_i32_0 = arith.constant 0 : i32
    return %arg0, %c0_i32 : i32, i32
  }
}

</mosaic_0001>

<bundles_post_ra>
// kernel: tpu_custom_call.1
= control target key start
LH: loop header
LB: loop body
LE: loop exit
PB: predicated region body
PF: predicated region fallthrough
CT: control target
= control target key end

     0   :  { %s5370_s0 = inlined_call_operand.vmem [shape: f32[8,16,12], index: 0, kind: input, shape index: {}]   ;;  %s5371_s1 = inlined_call_operand.vmem [shape: f32[12,32], index: 1, kind: input, shape index: {}]   ;;  %s5372_s2 = inlined_call_operand.vmem [shape: f32[1,32], index: 2, kind: input, shape index: {}]   ;;  %s5373_s3 = inlined_call_operand.vmem [shape: f32[1,32], index: 3, kind: input, shape index: {}]   ;;  %s5374_s4 = inlined_call_operand.vmem [shape: f32[96,64], index: 4, kind: input, shape index: {}]   ;;  %s5375_s5 = inlined_call_operand.vmem [shape: f32[1,64], index: 5, kind: input, shape index: {}]   ;;  %s5376_s6 = inlined_call_operand.vmem [shape: f32[1,64], index: 6, kind: input, shape index: {}]   ;;  %s5377_s7 = inlined_call_operand.hbm [shape: f32[192,128], index: 7, kind: input, shape index: {}]   ;;  %s5378_s8 = inlined_call_operand.vmem [shape: f32[1,128], index: 8, kind: input, shape index: {}]   ;;  %s5379_s9 = inlined_call_operand.vmem [shape: f32[1,128], index: 9, kind: input, shape index: {}]   ;;  %s5380_s10 = inlined_call_operand.vmem [shape: f32[128,256], index: 10, kind: input, shape index: {}]   ;;  %s5381_s11 = inlined_call_operand.vmem [shape: f32[1,256], index: 11, kind: input, shape index: {}]   ;;  %s5382_s12 = inlined_call_operand.hbm [shape: f32[256,128], index: 12, kind: input, shape index: {}]   ;;  %s5383_s13 = inlined_call_operand.vmem [shape: f32[1,128], index: 13, kind: input, shape index: {}]   ;;  %s5384_s14 = inlined_call_operand.vmem [shape: f32[128,128], index: 14, kind: input, shape index: {}]   ;;  %s5385_s15 = inlined_call_operand.vmem [shape: f32[1,128], index: 15, kind: input, shape index: {}]   ;;  %s5386_s16 = inlined_call_operand.hbm [shape: f32[8,128], index: 16, kind: output, shape index: {}]  }
   0x1   :  { %5405 = sst [smem:[#allocation27_spill]] %s5370_s0 }
   0x2   :  { %21 = vsyncpa [#allocation3], 0 }
   0x3   :  { %22 = vsyncpa [#allocation6], 0 }
   0x4   :  { %23 = vsyncpa [#allocation4], 0  ;;  %s3845_s21 = smov [#allocation2]   ;;  %s3773_s25 = scalar_lea.hbm %s5377_s7, 3072 }
   0x5   :  { %s43_s22 = sshll.u32 %s3845_s21, 4  ;;  %p3774_p0 = scmp.ne.s32.totalorder %s5377_s7, %s3773_s25  ;;  %s44_s22 = int_to_ptr.vmem [resolvable:$true] %s43_s22 }
   0x6   :  { %p3777_p1 = scmp.lt.u32.totalorder %s3773_s25, %s5377_s7 }
   0x8   :  { %p3779_p2 = pnand %p3777_p1, %p3774_p0 }
   0xa   :  { %3782 = shalt.err (!%p3779_p2)
}
   0xb   :  { %s3783_s30 = scalar_lea.vmem %s44_s22, 3072  ;;  %p3788_p4 = scmp.lt.s32.totalorder %s44_s22, %s44_s22 }
   0xc   :  { %p3784_p3 = scmp.ne.s32.totalorder %s44_s22, %s3783_s30  ;;  %p3789_p5 = scmp.lt.s32.totalorder %s3783_s30, %s3783_s30 }
   0xe   :  { %p3790_p6 = por %p3789_p5, %p3788_p4 }
  0x10   :  { %p3791_p7 = pnand %p3790_p6, %p3784_p3 }
  0x12   :  { %3794 = shalt.err (!%p3791_p7)
}
  0x13   :  { %s3846_s0 = smov 128   ;;  %s3847_s17 = smov 8  }
  0x14   :  { %49 = dma.hbm_to_vmem [thread:$0]  %s5377_s7, 3072, %s44_s22, [#allocation3], %s3846_s0, %s3846_s0, %s3847_s17  }
  0x15   :  { %s3848_s20 = smov [#allocation5]   ;;  %s3795_s25 = scalar_lea.hbm %s5382_s12, 4096 }
  0x16   :  { %s63_s21 = sshll.u32 %s3848_s20, 4  ;;  %p3796_p8 = scmp.ne.s32.totalorder %s5382_s12, %s3795_s25  ;;  %s64_s21 = int_to_ptr.vmem [resolvable:$true] %s63_s21 }
  0x17   :  { %p3799_p9 = scmp.lt.u32.totalorder %s3795_s25, %s5382_s12 }
  0x19   :  { %p3801_p10 = pnand %p3799_p9, %p3796_p8 }
  0x1b   :  { %3804 = shalt.err (!%p3801_p10)
}
  0x1c   :  { %s3805_s30 = scalar_lea.vmem %s64_s21, 4096  ;;  %p3810_p12 = scmp.lt.s32.totalorder %s64_s21, %s64_s21 }
  0x1d   :  { %p3806_p11 = scmp.ne.s32.totalorder %s64_s21, %s3805_s30  ;;  %p3811_p13 = scmp.lt.s32.totalorder %s3805_s30, %s3805_s30 }
  0x1f   :  { %p3812_p0 = por %p3811_p13, %p3810_p12 }
  0x21   :  { %p3813_p1 = pnand %p3812_p0, %p3806_p11 }
  0x23   :  { %3816 = shalt.err (!%p3813_p1)
}
  0x24   :  { %69 = dma.hbm_to_vmem [thread:$0]  %s5382_s12, 4096, %s64_s21, [#allocation6], %s3846_s0, %s3846_s0, %s3847_s17  }
  0x25   :  { %3839 = dma.done.wait [#allocation3], 3072  }
  0x26   :  { %3840 = vsyncadd [#allocation3], 4294964224 }
  0x27   :  { %3841 = dma.done.wait [#allocation6], 4096  }
  0x28   :  { %3842 = vsyncadd [#allocation6], 4294963200  ;;  %vm149_vm0 = vcmask 1043456   ;;  %vm100_vm1 = vcmask 97280   ;;  %vm3849_vm2 = vmmov 1   ;;  %v98_v0 = vld [vmem:[%s5371_s1] sm:$0xff]  ;;  %v412_v21 = vlaneseq }
  0x29   :  { %vm3608_vm3 = vmpackc.low %vm149_vm0, %vm3849_vm2  ;;  %v99_v1 = vld [vmem:[%s5371_s1 + $0x8] sm:$0xf]  ;;  %s5406_s26 = sld [smem:[#allocation27_spill]]  ;;  %v3850_v19 = vmov 1983009808   ;;  %v1587_v27 = vld [vmem:[%s5374_s4] sm:$0xff] }
  0x2a   :  { %v3607_v3 = vpack.c.bf16 %v99_v1, %v98_v0  ;;  %v410_v20 = vunpack.c.l.s4 %v3850_v19  ;;  %v4039_v22 = vld [vmem:[%s5372_s2] ss:$0 sm:$0xff]  ;;  %v4046_v26 = vshrl.u32 %v412_v21, 7  ;;  %v1588_v28 = vld [vmem:[%s5374_s4 + $0x8] sm:$0xff]  ;;  %v1589_v29 = vld [vmem:[%s5374_s4 + $0x10] sm:$0xff]  ;;  %s3852_s12 = smov 64  }
  0x2b   :  { %v4044_v23 = vld [vmem:[%s5373_s3] ss:$0 sm:$0xff]  ;;  %v3613_v32 = vpack.c.bf16 %v1588_v28, %v1587_v27  ;;  %v1590_v33 = vld [vmem:[%s5374_s4 + $0x18] sm:$0xff]  ;;  %v1592_v37 = vld [vmem:[%s5374_s4 + $0x28] sm:$0xff]  ;;  %s3856_s22 = smov [#allocation7]  }
  0x2c   :  { %3609 = vmatprep.subr.msk.bf16.mxu0 %vm3608_vm3, %v3607_v3  ;;  %v411_v25 = vunpack.c.0.s8 %v410_v20  ;;  %5407 = vst [vmem:[#allocation11_spill] sm:$0xff] %v4046_v26  ;;  %v3617_v35 = vpack.c.bf16 %v1590_v33, %v1589_v29  ;;  %v1591_v36 = vld [vmem:[%s5374_s4 + $0x20] sm:$0xff]  ;;  %v1593_v42 = vld [vmem:[%s5374_s4 + $0x30] sm:$0xff]  ;;  %v1594_v43 = vld [vmem:[%s5374_s4 + $0x38] sm:$0xff]  ;;  %v4082_v51 = vsub.s32 0, %v4046_v26  ;;  %s3251_s18 = sshll.u32 %s3856_s22, 4  ;;  %s3252_s18 = int_to_ptr.vmem [resolvable:$true] %s3251_s18 }
  0x2d   :  { %3612 = vmatpush3.bf16.msk.msra.mxu0 %vm3608_vm3, %v3607_v3  ;;  %3614 = vmatprep.subr.bf16.mxu1 %v3613_v32  ;;  %v3621_v47 = vpack.c.bf16 %v1592_v37, %v1591_v36  ;;  %v3625_v53 = vpack.c.bf16 %v1594_v43, %v1593_v42  ;;  %v1595_v54 = vld [vmem:[%s5374_s4 + $0x40] sm:$0xff]  ;;  %v1596_v55 = vld [vmem:[%s5374_s4 + $0x48] sm:$0xff]  ;;  %vm1280_vm3 = vcmask 1042434   ;;  %s3817_s19 = scalar_lea.vmem %s3252_s18, 128  ;;  %p3822_p3 = scmp.lt.s32.totalorder %s3252_s18, %s3252_s18 }
  0x2e   :  { %v4070_v39 = vsub.s32 %v411_v25, %v4046_v26  ;;  %3616 = vmatpush3.bf16.msra.mxu1 %v3613_v32  ;;  %v3629_v3 = vpack.c.bf16 %v1596_v55, %v1595_v54  ;;  %p3818_p2 = scmp.ne.s32.totalorder %s3252_s18, %s3817_s19  ;;  %p3823_p4 = scmp.lt.s32.totalorder %s3817_s19, %s3817_s19 }
  0x2f   :  { %v82_v2 = vld [vmem:[%s5406_s26] sm:$0xff]  ;;  %v83_v4 = vld [vmem:[%s5406_s26 + $0x8] sm:$0xff]  ;;  %v84_v5 = vld [vmem:[%s5406_s26 + $0x10] sm:$0xff]  ;;  %3618 = vmatprep.subr.bf16.mxu1 %v3617_v35 }
  0x30   :  { %3512 = vmatprep.mubr.msk.f32.mxu0 %vm100_vm1, %v82_v2  ;;  %v85_v6 = vld [vmem:[%s5406_s26 + $0x18] sm:$0xff]  ;;  %v86_v7 = vld [vmem:[%s5406_s26 + $0x20] sm:$0xff]  ;;  %v87_v8 = vld [vmem:[%s5406_s26 + $0x28] sm:$0xff]  ;;  %5408 = vst [vmem:[#allocation12_spill] sm:$0xff] %v4070_v39  ;;  %p3824_p5 = por %p3823_p4, %p3822_p3 }
  0x31   :  { %3513 = vmatmul.mubr.msk.f32.vlgmr.msra.gmra.mrb[0].mxu0 %vm100_vm1, %v83_v4  ;;  %v88_v9 = vld [vmem:[%s5406_s26 + $0x30] sm:$0xff]  ;;  %v89_v10 = vld [vmem:[%s5406_s26 + $0x38] sm:$0xff]  ;;  %v90_v11 = vld [vmem:[%s5406_s26 + $0x40] sm:$0xff] }
  0x32   :  { %3515 = vmatprep.mubr.msk.f32.mxu0 %vm100_vm1, %v84_v5  ;;  %v91_v12 = vld [vmem:[%s5406_s26 + $0x48] sm:$0xff]  ;;  %v92_v13 = vld [vmem:[%s5406_s26 + $0x50] sm:$0xff]  ;;  %v93_v14 = vld [vmem:[%s5406_s26 + $0x58] sm:$0xff]  ;;  %3620 = vmatpush3.bf16.msra.mxu1 %v3617_v35  ;;  %p3825_p6 = pnand %p3824_p5, %p3818_p2 }
  0x33   :  { %v94_v15 = vld [vmem:[%s5406_s26 + $0x60] sm:$0xff]  ;;  %v95_v16 = vld [vmem:[%s5406_s26 + $0x68] sm:$0xff]  ;;  %v96_v17 = vld [vmem:[%s5406_s26 + $0x70] sm:$0xff]  ;;  %3622 = vmatprep.subr.bf16.mxu1 %v3621_v47 }
  0x34   :  { %v97_v18 = vld [vmem:[%s5406_s26 + $0x78] sm:$0xff]  ;;  %s3851_s26 = smov 32  }
  0x35   :  { %3516 = vmatmul.mubr.msk.f32.gmra.mrb[2].mxu0 %vm100_vm1, %v85_v6 }
  0x36   :  { %3518 = vmatprep.mubr.msk.f32.mxu0 %vm100_vm1, %v86_v7  ;;  %3624 = vmatpush3.bf16.msra.mxu1 %v3621_v47 }
  0x37   :  { %3626 = vmatprep.subr.bf16.mxu1 %v3625_v53 }
  0x39   :  { %3519 = vmatmul.mubr.msk.f32.gmra.mrb[4].mxu0 %vm100_vm1, %v87_v8 }
  0x3a   :  { %3521 = vmatprep.mubr.msk.f32.mxu0 %vm100_vm1, %v88_v9  ;;  %3628 = vmatpush3.bf16.msra.mxu1 %v3625_v53 }
  0x3b   :  { %3630 = vmatprep.subr.bf16.mxu1 %v3629_v3 }
  0x3d   :  { %3522 = vmatmul.mubr.msk.f32.gmra.mrb[6].mxu0 %vm100_vm1, %v89_v10 }
  0x3e   :  { %3524 = vmatprep.mubr.msk.f32.mxu0 %vm100_vm1, %v90_v11  ;;  %3632 = vmatpush3.bf16.msra.mxu1 %v3629_v3 }
  0x41   :  { %3525 = vmatmul.mubr.msk.f32.gmra.mrb[8].mxu0 %vm100_vm1, %v91_v12 }
  0x42   :  { %3527 = vmatprep.mubr.msk.f32.mxu0 %vm100_vm1, %v92_v13 }
  0x45   :  { %3528 = vmatmul.mubr.msk.f32.gmra.mrb[10].mxu0 %vm100_vm1, %v93_v14 }
  0x46   :  { %3530 = vmatprep.mubr.msk.f32.mxu0 %vm100_vm1, %v94_v15 }
  0x49   :  { %3531 = vmatmul.mubr.msk.f32.gmra.mrb[12].mxu0 %vm100_vm1, %v95_v16 }
  0x4a   :  { %3533 = vmatprep.mubr.msk.f32.mxu0 %vm100_vm1, %v96_v17 }
  0x4d   :  { %3534 = vmatmul.mubr.msk.f32.gmra.mrb[14].mxu0 %vm100_vm1, %v97_v18  ;;  %vm1391_vm1 = vcmask 1041409  }
 0x104   :  { %v3514_v24 = vpop.f32.mrb[0].mxu0 }
 0x105   :  { %v306_v30 = vmul.f32 %v3514_v24, %v4039_v22  ;;  %v219_v31 = vpop.f32.mrb[1].mxu0 }
 0x106   :  { %v305_v34 = vmul.f32 %v4039_v22, %v219_v31 }
 0x107   :  { %v329_v38 = vadd.f32 %v4044_v23, %v306_v30 }
 0x108   :  { %v328_v40 = vadd.f32 %v4044_v23, %v305_v34  ;;  %v3517_v41 = vpop.f32.mrb[2].mxu0 }
 0x109   :  { %vm345_vm4 = vcmp.gt.f32.partialorder %v329_v38, 0.0  ;;  %v361_v44 = vmul.f32 0.2, %v329_v38  ;;  %v308_v45 = vmul.f32 %v3517_v41, %v4039_v22  ;;  %v229_v46 = vpop.f32.mrb[3].mxu0 }
 0x10a   :  { %vm344_vm5 = vcmp.gt.f32.partialorder %v328_v40, 0.0  ;;  %v360_v48 = vmul.f32 0.2, %v328_v40  ;;  %v307_v49 = vmul.f32 %v4039_v22, %v229_v46 }
 0x10b   :  { %v377_v50 = vsel %vm345_vm4, %v329_v38, %v361_v44  ;;  %v331_v52 = vadd.f32 %v4044_v23, %v308_v45  ;;  %vm1282_vm4 = vcmask 1043459  }
 0x10c   :  { %v425_v56 = vcombine.high %v377_v50, %v377_v50  ;;  %v432_v57 = vrot.slane %v377_v50, %v4070_v39  ;;  %v376_v58 = vsel %vm344_vm5, %v328_v40, %v360_v48  ;;  %v330_v59 = vadd.f32 %v4044_v23, %v307_v49  ;;  %v3520_v60 = vpop.f32.mrb[4].mxu0 }
 0x10d   :  { %v408_v61 = vcombine.high %v376_v58, %v376_v58  ;;  %v415_v62 = vrot.slane %v376_v58, %v4070_v39  ;;  %vm347_vm6 = vcmp.gt.f32.partialorder %v331_v52, 0.0  ;;  %v363_v63 = vmul.f32 0.2, %v331_v52  ;;  %v239_v0 = vpop.f32.mrb[5].mxu0 }
 0x10e   :  { %v4095_v1 = vrot.slane %v425_v56, %v4070_v39  ;;  %v3284_v2 = vrot.slane %v432_v57, 9  ;;  %vm346_vm7 = vcmp.gt.f32.partialorder %v330_v59, 0.0  ;;  %v4098_v8 = vcombine.high %v432_v57, %v432_v57 }
 0x10f   :  { %v422_v4 = vrot.slane %v408_v61, %v4070_v39  ;;  %v423_v5 = vcombine.high %v415_v62, %v415_v62  ;;  %v3280_v6 = vrot.slane %v415_v62, 9  ;;  %v379_v7 = vsel %vm347_vm6, %v331_v52, %v363_v63 }
 0x110   :  { %v459_v9 = vcombine.high %v379_v7, %v379_v7  ;;  %v466_v10 = vrot.slane %v379_v7, %v4070_v39  ;;  %v362_v11 = vmul.f32 0.2, %v330_v59  ;;  %v3523_v12 = vpop.f32.mrb[6].mxu0  ;;  %v4103_v18 = vmax.f32 %v432_v57, %v3284_v2 }
 0x111   :  { %v4101_v13 = vcombine.high %v422_v4, %v422_v4  ;;  %v3281_v14 = vrot.slane %v423_v5, 9  ;;  %v3282_v15 = vrot.slane %v422_v4, 9  ;;  %v936_v16 = vmax.f32 %v415_v62, %v3280_v6  ;;  %v249_v17 = vpop.f32.mrb[7].mxu0 }
 0x112   :  { %v4105_v19 = vcombine.high %v466_v10, %v466_v10  ;;  %v3292_v20 = vrot.slane %v466_v10, 9  ;;  %v378_v21 = vsel %vm346_vm7, %v330_v59, %v362_v11  ;;  %v4112_v28 = vrot.slane %v459_v9, %v4070_v39 }
 0x113   :  { %v3283_v24 = vrot.slane %v4101_v13, 9  ;;  %v937_v25 = vmax.f32 %v423_v5, %v3281_v14  ;;  %v4109_v27 = vmax.f32 %v422_v4, %v3282_v15  ;;  %v4115_v29 = vrot.slane %v936_v16, %v4082_v51 }
 0x114   :  { %v442_v31 = vcombine.high %v378_v21, %v378_v21  ;;  %v449_v32 = vrot.slane %v378_v21, %v4070_v39  ;;  %v3526_v33 = vpop.f32.mrb[8].mxu0  ;;  %v4119_v34 = vmax.f32 %v466_v10, %v3292_v20  ;;  %v310_v35 = vmul.f32 %v3520_v60, %v4039_v22 }
 0x115   :  { %v309_v36 = vmul.f32 %v4039_v22, %v239_v0  ;;  %v312_v37 = vmul.f32 %v3523_v12, %v4039_v22  ;;  %v4124_v38 = vpop.f32.mrb[9].mxu0  ;;  %v4127_v40 = vrot.slane %v937_v25, %v4082_v51  ;;  %v311_v47 = vmul.f32 %v4039_v22, %v249_v17 }
 0x116   :  { %v456_v41 = vrot.slane %v442_v31, %v4070_v39  ;;  %v457_v42 = vcombine.high %v449_v32, %v449_v32  ;;  %v3288_v43 = vrot.slane %v449_v32, 9  ;;  %v333_v44 = vadd.f32 %v4044_v23, %v310_v35 }
 0x117   :  { %v332_v45 = vadd.f32 %v4044_v23, %v309_v36  ;;  %v335_v46 = vadd.f32 %v4044_v23, %v312_v37  ;;  %v314_v59 = vmul.f32 %v3526_v33, %v4039_v22  ;;  %v334_v16 = vadd.f32 %v4044_v23, %v311_v47 }
 0x118   :  { %v458_v48 = vcombine.high %v456_v41, %v456_v41  ;;  %v3289_v49 = vrot.slane %v457_v42, 9  ;;  %v3290_v50 = vrot.slane %v456_v41, 9  ;;  %v944_v52 = vmax.f32 %v449_v32, %v3288_v43  ;;  %v3529_v53 = vpop.f32.mrb[10].mxu0 }
 0x119   :  { %vm349_vm8 = vcmp.gt.f32.partialorder %v333_v44, 0.0  ;;  %v365_v54 = vmul.f32 0.2, %v333_v44  ;;  %vm348_vm9 = vcmp.gt.f32.partialorder %v332_v45, 0.0  ;;  %v364_v55 = vmul.f32 0.2, %v332_v45 }
 0x11a   :  { %v3291_v56 = vrot.slane %v458_v48, 9  ;;  %v945_v57 = vmax.f32 %v457_v42, %v3289_v49  ;;  %v946_v58 = vmax.f32 %v456_v41, %v3290_v50  ;;  %v269_v60 = vpop.f32.mrb[11].mxu0  ;;  %vm351_vm10 = vcmp.gt.f32.partialorder %v335_v46, 0.0 }
 0x11b   :  { %v381_v61 = vsel %vm349_vm8, %v333_v44, %v365_v54  ;;  %v380_v62 = vsel %vm348_vm9, %v332_v45, %v364_v55  ;;  %v367_v63 = vmul.f32 0.2, %v335_v46  ;;  %v4138_v2 = vrot.slane %v944_v52, %v4082_v51 }
 0x11c   :  { %v4135_v0 = vmax.f32 %v458_v48, %v3291_v56  ;;  %v4141_v3 = vrot.slane %v945_v57, %v4082_v51  ;;  %v493_v4 = vcombine.high %v381_v61, %v381_v61  ;;  %v3532_v5 = vpop.f32.mrb[12].mxu0  ;;  %v500_v6 = vrot.slane %v381_v61, %v4070_v39 }
 0x11d   :  { %5409 = vst [vmem:[#allocation13_spill] sm:$0xff] %v4138_v2  ;;  %v476_v7 = vcombine.high %v380_v62, %v380_v62  ;;  %v483_v9 = vrot.slane %v380_v62, %v4070_v39  ;;  %v383_v10 = vsel %vm351_vm10, %v335_v46, %v367_v63  ;;  %v4145_v11 = vpop.f32.mrb[13].mxu0  ;;  %v4148_v12 = vrot.slane %v946_v58, %v4082_v51 }
 0x11e   :  { %5410 = vst [vmem:[#allocation14_spill] sm:$0xff] %v4141_v3  ;;  %v527_v14 = vcombine.high %v383_v10, %v383_v10  ;;  %v534_v15 = vrot.slane %v383_v10, %v4070_v39  ;;  %v4152_v17 = vcombine.high %v500_v6, %v500_v6  ;;  %v3300_v20 = vrot.slane %v500_v6, 9 }
 0x11f   :  { %v490_v21 = vrot.slane %v476_v7, %v4070_v39  ;;  %v491_v25 = vcombine.high %v483_v9, %v483_v9  ;;  %v4156_v31 = vrot.slane %v493_v4, %v4070_v39  ;;  %v3296_v32 = vrot.slane %v483_v9, 9 }
 0x120   :  { %v4158_v33 = vcombine.high %v534_v15, %v534_v15  ;;  %v3308_v35 = vrot.slane %v534_v15, 9  ;;  %v4160_v36 = vpop.f32.mrb[14].mxu0  ;;  %v4164_v43 = vrot.slane %v527_v14, %v4070_v39  ;;  %v4168_v45 = vmax.f32 %v500_v6, %v3300_v20 }
 0x121   :  { %v492_v41 = vcombine.high %v490_v21, %v490_v21  ;;  %v3297_v42 = vrot.slane %v491_v25, 9  ;;  %v4166_v44 = vpop.f32.mrb[15].mxu0  ;;  %v3298_v46 = vrot.slane %v490_v21, 9  ;;  %v952_v47 = vmax.f32 %v483_v9, %v3296_v32 }
 0x122   :  { %vm350_vm11 = vcmp.gt.f32.partialorder %v334_v16, 0.0  ;;  %v366_v52 = vmul.f32 0.2, %v334_v16  ;;  %v4171_v55 = vmax.f32 %v534_v15, %v3308_v35  ;;  %v337_v56 = vadd.f32 %v4044_v23, %v314_v59 }
 0x123   :  { %v3299_v49 = vrot.slane %v492_v41, 9  ;;  %v953_v50 = vmax.f32 %v491_v25, %v3297_v42  ;;  %v954_v54 = vmax.f32 %v490_v21, %v3298_v46  ;;  %v313_v57 = vmul.f32 %v4039_v22, %v4124_v38 }
 0x124   :  { %v4179_v61 = vrot.slane %v952_v47, %v4082_v51  ;;  %v382_v62 = vsel %vm350_vm11, %v334_v16, %v366_v52  ;;  %v316_v63 = vmul.f32 %v3529_v53, %v4039_v22  ;;  %vm353_vm12 = vcmp.gt.f32.partialorder %v337_v56, 0.0 }
 0x125   :  { %v4176_v58 = vmax.f32 %v492_v41, %v3299_v49  ;;  %v4183_v4 = vrot.slane %v953_v50, %v4082_v51  ;;  %v510_v6 = vcombine.high %v382_v62, %v382_v62  ;;  %v517_v7 = vrot.slane %v382_v62, %v4070_v39 }
 0x126   :  { %v4187_v59 = vrot.slane %v954_v54, %v4082_v51  ;;  %v369_v9 = vmul.f32 0.2, %v337_v56  ;;  %v336_v38 = vadd.f32 %v4044_v23, %v313_v57  ;;  %v339_v10 = vadd.f32 %v4044_v23, %v316_v63 }
 0x127   :  { %v524_v14 = vrot.slane %v510_v6, %v4070_v39  ;;  %v525_v15 = vcombine.high %v517_v7, %v517_v7  ;;  %v3304_v16 = vrot.slane %v517_v7, 9  ;;  %v315_v53 = vmul.f32 %v4039_v22, %v269_v60 }
 0x128   :  { %v385_v20 = vsel %vm353_vm12, %v337_v56, %v369_v9  ;;  %vm352_vm13 = vcmp.gt.f32.partialorder %v336_v38, 0.0  ;;  %v368_v21 = vmul.f32 0.2, %v336_v38  ;;  %v318_v25 = vmul.f32 %v3532_v5, %v4039_v22 }
 0x129   :  { %v526_v32 = vcombine.high %v524_v14, %v524_v14  ;;  %v3305_v35 = vrot.slane %v525_v15, 9  ;;  %v3306_v41 = vrot.slane %v524_v14, 9  ;;  %v960_v42 = vmax.f32 %v517_v7, %v3304_v16 }
 0x12a   :  { %v561_v46 = vcombine.high %v385_v20, %v385_v20  ;;  %v568_v47 = vrot.slane %v385_v20, %v4070_v39  ;;  %v384_v49 = vsel %vm352_vm13, %v336_v38, %v368_v21  ;;  %v371_v50 = vmul.f32 0.2, %v339_v10 }
 0x12b   :  { %v3307_v52 = vrot.slane %v526_v32, 9  ;;  %v961_v54 = vmax.f32 %v525_v15, %v3305_v35  ;;  %v962_v57 = vmax.f32 %v524_v14, %v3306_v41  ;;  %vm355_vm14 = vcmp.gt.f32.partialorder %v339_v10, 0.0 }
 0x12c   :  { %v4196_v60 = vrot.slane %v960_v42, %v4082_v51  ;;  %v4199_v56 = vrot.slane %v561_v46, %v4070_v39  ;;  %v4201_v5 = vcombine.high %v568_v47, %v568_v47  ;;  %v544_v62 = vcombine.high %v384_v49, %v384_v49 }
 0x12d   :  { %v4203_v63 = vmax.f32 %v526_v32, %v3307_v52  ;;  %v4206_v6 = vrot.slane %v961_v54, %v4082_v51  ;;  %v3316_v7 = vrot.slane %v568_v47, 9  ;;  %v551_v9 = vrot.slane %v384_v49, %v4070_v39 }
 0x12e   :  { %v4210_v38 = vrot.slane %v962_v57, %v4082_v51  ;;  %v558_v15 = vrot.slane %v544_v62, %v4070_v39  ;;  %v387_v16 = vsel %vm355_vm14, %v339_v10, %v371_v50  ;;  %v338_v46 = vadd.f32 %v4044_v23, %v315_v53 }
 0x12f   :  { %v559_v20 = vcombine.high %v551_v9, %v551_v9  ;;  %v3312_v21 = vrot.slane %v551_v9, 9  ;;  %v595_v35 = vcombine.high %v387_v16, %v387_v16  ;;  %v602_v32 = vrot.slane %v387_v16, %v4070_v39 }
 0x130   :  { %v560_v41 = vcombine.high %v558_v15, %v558_v15  ;;  %v3314_v42 = vrot.slane %v558_v15, 9  ;;  %v341_v52 = vadd.f32 %v4044_v23, %v318_v25  ;;  %v4217_v49 = vmax.f32 %v568_v47, %v3316_v7 }
 0x131   :  { %v3313_v54 = vrot.slane %v559_v20, 9  ;;  %v968_v57 = vmax.f32 %v551_v9, %v3312_v21  ;;  %v4219_v48 = vcombine.high %v602_v32, %v602_v32  ;;  %v3324_v10 = vrot.slane %v602_v32, 9 }
 0x132   :  { %v3315_v14 = vrot.slane %v560_v41, 9  ;;  %v970_v62 = vmax.f32 %v558_v15, %v3314_v42  ;;  %vm354_vm15 = vcmp.gt.f32.partialorder %v338_v46, 0.0  ;;  %v4225_v16 = vrot.slane %v595_v35, %v4070_v39 }
 0x133   :  { %5411 = vst [vmem:[#allocation15_spill] sm:$0xff] %v4219_v48  ;;  %v969_v50 = vmax.f32 %v559_v20, %v3313_v54  ;;  %v4222_v37 = vrot.slane %v968_v57, %v4082_v51  ;;  %v370_v53 = vmul.f32 0.2, %v338_v46  ;;  %vm357_vm0 = vcmp.gt.f32.partialorder %v341_v52, 0.0 }
 0x134   :  { %5413 = vst [vmem:[#allocation17_spill] sm:$0xff] %v4225_v16  ;;  %v4227_v30 = vmax.f32 %v560_v41, %v3315_v14  ;;  %v4230_v25 = vrot.slane %v970_v62, %v4082_v51  ;;  %v4233_v7 = vmax.f32 %v602_v32, %v3324_v10  ;;  %v373_v15 = vmul.f32 0.2, %v341_v52 }
 0x135   :  { %5412 = vst [vmem:[#allocation16_spill] sm:$0xff] %v4222_v37  ;;  %v386_v9 = vsel %vm354_vm15, %v338_v46, %v370_v53  ;;  %v317_v20 = vmul.f32 %v4039_v22, %v4145_v11  ;;  %v4238_v21 = vrot.slane %v969_v50, %v4082_v51  ;;  %v441_v41 = vcombine.high %v4095_v1, %v4095_v1 }
 0x136   :  { %5414 = vst [vmem:[#allocation18_spill] sm:$0xff] %v4230_v25  ;;  %5415 = vst [vmem:[#allocation19_spill] sm:$0xff] %v4233_v7  ;;  %v578_v35 = vcombine.high %v386_v9, %v386_v9  ;;  %v585_v14 = vrot.slane %v386_v9, %v4070_v39  ;;  %v389_v42 = vsel %vm357_vm0, %v341_v52, %v373_v15  ;;  %v3285_v32 = vrot.slane %v4098_v8, 9 }
 0x137   :  { %5416 = vst [vmem:[#allocation20_spill] sm:$0xff] %v4238_v21  ;;  %v340_v54 = vadd.f32 %v4044_v23, %v317_v20  ;;  %v3286_v46 = vrot.slane %v4095_v1, 9  ;;  %v629_v10 = vcombine.high %v389_v42, %v389_v42  ;;  %v636_v50 = vrot.slane %v389_v42, %v4070_v39 }
 0x138   :  { %v592_v57 = vrot.slane %v578_v35, %v4070_v39  ;;  %v593_v11 = vcombine.high %v585_v14, %v585_v14  ;;  %v3320_v62 = vrot.slane %v585_v14, 9  ;;  %v939_v52 = vmax.f32 %v4101_v13, %v3283_v24 }
 0x139   :  { %vm356_vm2 = vcmp.gt.f32.partialorder %v340_v54, 0.0  ;;  %v372_v53 = vmul.f32 0.2, %v340_v54  ;;  %v4251_v26 = vcombine.high %v636_v50, %v636_v50  ;;  %v3332_v35 = vrot.slane %v636_v50, 9 }
 0x13a   :  { %v594_v9 = vcombine.high %v592_v57, %v592_v57  ;;  %v3321_v15 = vrot.slane %v593_v11, 9  ;;  %v3322_v20 = vrot.slane %v592_v57, 9  ;;  %v976_v47 = vmax.f32 %v585_v14, %v3320_v62 }
 0x13b   :  { %v388_v7 = vsel %vm356_vm2, %v340_v54, %v372_v53  ;;  %v3287_v48 = vrot.slane %v441_v41, 9  ;;  %vm1284_vm5 = vcmask 1044484   ;;  %v4254_v21 = vrot.slane %v629_v10, %v4070_v39 }
 0x13c   :  { %v3323_v16 = vrot.slane %v594_v9, 9  ;;  %v977_v42 = vmax.f32 %v593_v11, %v3321_v15  ;;  %v978_v25 = vmax.f32 %v592_v57, %v3322_v20  ;;  %vm1286_vm6 = vcmask 1045509  }
 0x13d   :  { %v4257_v13 = vrot.slane %v976_v47, %v4082_v51  ;;  %v612_v14 = vcombine.high %v388_v7, %v388_v7  ;;  %v619_v62 = vrot.slane %v388_v7, %v4070_v39  ;;  %vm1288_vm7 = vcmask 1046534  }
 0x13e   :  { %v4261_v37 = vmax.f32 %v594_v9, %v3323_v16  ;;  %v4264_v54 = vrot.slane %v977_v42, %v4082_v51  ;;  %v4266_v11 = vmax.f32 %v636_v50, %v3332_v35  ;;  %v941_v57 = vmax.f32 %v4098_v8, %v3285_v32 }
 0x13f   :  { %vm1290_vm8 = vcmask 1047559   ;;  %v626_v10 = vrot.slane %v612_v14, %v4070_v39  ;;  %v627_v47 = vcombine.high %v619_v62, %v619_v62  ;;  %v3328_v53 = vrot.slane %v619_v62, 9 }
 0x140   :  { %5417 = vst [vmem:[#allocation21_spill] sm:$0xff] %v4264_v54  ;;  %v942_v15 = vmax.f32 %v4095_v1, %v3286_v46  ;;  %v4272_v20 = vrot.slane %v978_v25, %v4082_v51  ;;  %v943_v7 = vmax.f32 %v441_v41, %v3287_v48  ;;  %v4276_v16 = vrot.slane %v4109_v27, %v4082_v51 }
 0x141   :  { %v4279_v50 = vrot.slane %v939_v52, %v4082_v51  ;;  %vm1448_vm9 = vcmask 1046528   ;;  %v628_v8 = vcombine.high %v626_v10, %v626_v10  ;;  %v3329_v32 = vrot.slane %v627_v47, 9 }
 0x142   :  { %v3330_v9 = vrot.slane %v626_v10, 9  ;;  %v984_v35 = vmax.f32 %v619_v62, %v3328_v53  ;;  %v4283_v42 = vrot.slane %v4103_v18, %v4082_v51  ;;  %v4286_v1 = vrot.slane %v941_v57, %v4082_v51 }
 0x143   :  { %v4289_v48 = vrot.slane %v942_v15, %v4082_v51  ;;  %v1457_v27 = vsel %vm1391_vm1, %v4127_v40, %v4115_v29  ;;  %v3331_v25 = vrot.slane %v628_v8, 9  ;;  %v985_v41 = vmax.f32 %v627_v47, %v3329_v32 }
 0x144   :  { %v986_v46 = vmax.f32 %v626_v10, %v3330_v9  ;;  %v1362_v52 = vrot.slane %v943_v7, %v4082_v51  ;;  %v1458_v14 = vsel %vm1280_vm3, %v4276_v16, %v1457_v27  ;;  %v1392_v18 = vsel %vm1391_vm1, %v4276_v16, %v4127_v40 }
 0x145   :  { %5418 = vst [vmem:[#allocation22_spill] sm:$0xff] %v4289_v48  ;;  %v320_v62 = vmul.f32 %v4160_v36, %v4039_v22  ;;  %v319_v57 = vmul.f32 %v4039_v22, %v4166_v44  ;;  %v4304_v53 = vmax.f32 %v628_v8, %v3331_v25  ;;  %v4307_v47 = vrot.slane %v984_v35, %v4082_v51 }
 0x146   :  { %v4310_v10 = vrot.slane %v985_v41, %v4082_v51  ;;  %v1459_v15 = vsel %vm1282_vm4, %v4279_v50, %v1458_v14  ;;  %v1393_v36 = vsel %vm1280_vm3, %v4279_v50, %v1392_v18  ;;  %v475_v9 = vcombine.high %v4112_v28, %v4112_v28 }
 0x147   :  { %v1460_v7 = vsel %vm1284_vm5, %v4283_v42, %v1459_v15  ;;  %v343_v32 = vadd.f32 %v4044_v23, %v320_v62  ;;  %v342_v22 = vadd.f32 %v4044_v23, %v319_v57  ;;  %v1394_v8 = vsel %vm1282_vm4, %v4283_v42, %v1393_v36 }
 0x148   :  { %v1461_v44 = vsel %vm1286_vm6, %v4286_v1, %v1460_v7  ;;  %v3294_v35 = vrot.slane %v4112_v28, 9  ;;  %v1395_v25 = vsel %vm1284_vm5, %v4286_v1, %v1394_v8  ;;  %v3295_v15 = vrot.slane %v475_v9, 9 }
 0x149   :  { %v1462_v27 = vsel %vm1288_vm7, %v4289_v48, %v1461_v44  ;;  %vm359_vm10 = vcmp.gt.f32.partialorder %v343_v32, 0.0  ;;  %v375_v41 = vmul.f32 0.2, %v343_v32  ;;  %v1396_v14 = vsel %vm1286_vm6, %v4289_v48, %v1395_v25 }
 0x14a   :  { %v1463_v23 = vsel %vm1290_vm8, %v1362_v52, %v1462_v27  ;;  %vm358_vm11 = vcmp.gt.f32.partialorder %v342_v22, 0.0  ;;  %v374_v18 = vmul.f32 0.2, %v342_v22  ;;  %v1397_v62 = vsel %vm1288_vm7, %v1362_v52, %v1396_v14 }
 0x14b   :  { %1513 = vrot.lane.b32.xlu0 %v1463_v23, %s3851_s26  ;;  %v391_v57 = vsel %vm359_vm10, %v343_v32, %v375_v41  ;;  %v5419_v7 = vrot.slane %v4105_v19, 9  ;;  %v1449_v44 = vsel %vm1448_vm9, %v1397_v62, 0.0  ;;  %v4342_v25 = vrot.slane %v986_v46, %v4082_v51 }
 0x14c   :  { %v663_v8 = vcombine.high %v391_v57, %v391_v57  ;;  %v670_v27 = vrot.slane %v391_v57, %v4070_v39  ;;  %v390_v24 = vsel %vm358_vm11, %v342_v22, %v374_v18  ;;  %1545 = vrot.lane.b32.xlu1 %v1449_v44, %s3852_s12  ;;  %v950_v32 = vmax.f32 %v4112_v28, %v3294_v35 }
 0x14d   :  { %v949_v36 = vmax.f32 %v4105_v19, %v5419_v7  ;;  %v646_v23 = vcombine.high %v390_v24, %v390_v24  ;;  %v653_v52 = vrot.slane %v390_v24, %v4070_v39  ;;  %v951_v62 = vmax.f32 %v475_v9, %v3295_v15 }
 0x14e   :  { %v4348_v41 = vrot.slane %v663_v8, %v4070_v39  ;;  %v4350_v19 = vcombine.high %v670_v27, %v670_v27  ;;  %v3340_v14 = vrot.slane %v670_v27, 9  ;;  %v4355_v57 = vrot.slane %v4135_v0, %v4082_v51 }
 0x14f   :  { %v660_v22 = vrot.slane %v646_v23, %v4070_v39  ;;  %v661_v18 = vcombine.high %v653_v52, %v653_v52  ;;  %v3336_v46 = vrot.slane %v653_v52, 9  ;;  %v4362_v28 = vrot.slane %v4119_v34, %v4082_v51 }
 0x150   :  { %v4358_v24 = vmax.f32 %v670_v27, %v3340_v14  ;;  %v4365_v35 = vrot.slane %v949_v36, %v4082_v51  ;;  %v4368_v23 = vrot.slane %v950_v32, %v4082_v51  ;;  %v1464_v0 = vsel %vm1391_vm1, %v4141_v3, %v4138_v2 }
 0x151   :  { %v662_v9 = vcombine.high %v660_v22, %v660_v22  ;;  %v3337_v15 = vrot.slane %v661_v18, 9  ;;  %v3338_v44 = vrot.slane %v660_v22, 9  ;;  %v992_v8 = vmax.f32 %v653_v52, %v3336_v46 }
 0x152   :  { %v1398_v27 = vsel %vm1391_vm1, %v4148_v12, %v4141_v3  ;;  %v509_v34 = vcombine.high %v4156_v31, %v4156_v31  ;;  %v1366_v52 = vrot.slane %v951_v62, %v4082_v51  ;;  %v1465_v32 = vsel %vm1280_vm3, %v4148_v12, %v1464_v0 }
 0x153   :  { %v3339_v36 = vrot.slane %v662_v9, 9  ;;  %v993_v14 = vmax.f32 %v661_v18, %v3337_v15  ;;  %v4378_v7 = vmax.f32 %v660_v22, %v3338_v44  ;;  %v1399_v46 = vsel %vm1280_vm3, %v4355_v57, %v1398_v27 }
 0x154   :  { %v3302_v39 = vrot.slane %v4156_v31, 9  ;;  %v3303_v2 = vrot.slane %v509_v34, 9  ;;  %v4389_v3 = vrot.slane %v992_v8, %v4082_v51  ;;  %v1466_v62 = vsel %vm1282_vm4, %v4355_v57, %v1465_v32 }
 0x155   :  { %v4386_v48 = vmax.f32 %v662_v9, %v3339_v36  ;;  %v4392_v18 = vrot.slane %v993_v14, %v4082_v51  ;;  %v1467_v22 = vsel %vm1284_vm5, %v4362_v28, %v1466_v62  ;;  %v1400_v15 = vsel %vm1282_vm4, %v4362_v28, %v1399_v46 }
 0x156   :  { %v5420_v44 = vrot.slane %v4152_v17, 9  ;;  %v958_v0 = vmax.f32 %v4156_v31, %v3302_v39  ;;  %v1468_v8 = vsel %vm1286_vm6, %v4365_v35, %v1467_v22  ;;  %v1401_v27 = vsel %vm1284_vm5, %v4365_v35, %v1400_v15 }
 0x157   :  { %v959_v36 = vmax.f32 %v509_v34, %v3303_v2  ;;  %v4410_v14 = vrot.slane %v4176_v58, %v4082_v51  ;;  %v1469_v32 = vsel %vm1288_vm7, %v4368_v23, %v1468_v8  ;;  %v1402_v46 = vsel %vm1286_vm6, %v4368_v23, %v1401_v27 }
 0x158   :  { %v957_v9 = vmax.f32 %v4152_v17, %v5420_v44  ;;  %v4418_v39 = vrot.slane %v4168_v45, %v4082_v51  ;;  %v1470_v31 = vsel %vm1290_vm8, %v1366_v52, %v1469_v32  ;;  %v1403_v2 = vsel %vm1288_vm7, %v1366_v52, %v1402_v46 }
 0x159   :  { %v4426_v58 = vrot.slane %v958_v0, %v4082_v51  ;;  %v1370_v34 = vrot.slane %v959_v36, %v4082_v51  ;;  %1515 = vrot.lane.b32.xlu0 %v1470_v31, %s3851_s26  ;;  %v1450_v62 = vsel %vm1448_vm9, %v1403_v2, 0.0  ;;  %v1471_v45 = vsel %vm1391_vm1, %v4183_v4, %v4179_v61 }
 0x15a   :  { %v4421_v17 = vrot.slane %v957_v9, %v4082_v51  ;;  %v1404_v22 = vsel %vm1391_vm1, %v4187_v59, %v4183_v4  ;;  %v543_v52 = vcombine.high %v4164_v43, %v4164_v43  ;;  %1547 = vrot.lane.b32.xlu1 %v1450_v62, %s3852_s12  ;;  %v1472_v15 = vsel %vm1280_vm3, %v4187_v59, %v1471_v45 }
 0x15b   :  { %5422 = vst [vmem:[#allocation24_spill] sm:$0xff] %v4426_v58  ;;  %v1405_v44 = vsel %vm1280_vm3, %v4410_v14, %v1404_v22  ;;  %v3310_v9 = vrot.slane %v4164_v43, 9  ;;  %v5423_v0 = vrot.slane %v4158_v33, 9  ;;  %v1473_v27 = vsel %vm1282_vm4, %v4410_v14, %v1472_v15 }
 0x15c   :  { %5421 = vst [vmem:[#allocation23_spill] sm:$0xff] %v4421_v17  ;;  %v1406_v36 = vsel %vm1282_vm4, %v4418_v39, %v1405_v44  ;;  %v3311_v32 = vrot.slane %v543_v52, 9  ;;  %v4454_v46 = vrot.slane %v4203_v63, %v4082_v51  ;;  %v1474_v31 = vsel %vm1284_vm5, %v4418_v39, %v1473_v27 }
 0x15d   :  { %v965_v8 = vmax.f32 %v4158_v33, %v5423_v0  ;;  %v1407_v2 = vsel %vm1284_vm5, %v4421_v17, %v1406_v36  ;;  %v966_v62 = vmax.f32 %v4164_v43, %v3310_v9  ;;  %v4463_v33 = vrot.slane %v4171_v55, %v4082_v51 }
 0x15e   :  { %v1475_v45 = vsel %vm1286_vm6, %v4421_v17, %v1474_v31  ;;  %v1408_v22 = vsel %vm1286_vm6, %v4426_v58, %v1407_v2  ;;  %v967_v63 = vmax.f32 %v543_v52, %v3311_v32  ;;  %v1478_v55 = vsel %vm1391_vm1, %v4206_v6, %v4196_v60 }
 0x15f   :  { %v4470_v15 = vrot.slane %v965_v8, %v4082_v51  ;;  %v1476_v44 = vsel %vm1288_vm7, %v4426_v58, %v1475_v45  ;;  %v1409_v0 = vsel %vm1288_vm7, %v1370_v34, %v1408_v22  ;;  %v4476_v43 = vrot.slane %v966_v62, %v4082_v51  ;;  %v5431_v58 = vld [vmem:[#allocation15_spill] sm:$0xff] }
 0x160   :  { %v1477_v9 = vsel %vm1290_vm8, %v1370_v34, %v1476_v44  ;;  %v1451_v27 = vsel %vm1448_vm9, %v1409_v0, 0.0  ;;  %v1374_v52 = vrot.slane %v967_v63, %v4082_v51  ;;  %v1479_v8 = vsel %vm1280_vm3, %v4210_v38, %v1478_v55 }
 0x161   :  { %5424 = vst [vmem:[#allocation25_spill] sm:$0xff] %v4470_v15  ;;  %5425 = vst [vmem:[#allocation26_spill] sm:$0xff] %v4476_v43  ;;  %1517 = vrot.lane.b32.xlu0 %v1477_v9, %s3851_s26  ;;  %v1480_v36 = vsel %vm1282_vm4, %v4454_v46, %v1479_v8  ;;  %v1410_v32 = vsel %vm1391_vm1, %v4210_v38, %v4206_v6  ;;  %v577_v31 = vcombine.high %v4199_v56, %v4199_v56  ;;  %vm1342_vm12 = vcmask 1040384  }
 0x162   :  { %v3318_v34 = vrot.slane %v4199_v56, 9  ;;  %v1481_v2 = vsel %vm1284_vm5, %v4463_v33, %v1480_v36  ;;  %v1411_v62 = vsel %vm1280_vm3, %v4454_v46, %v1410_v32  ;;  %v5426_v45 = vrot.slane %v4201_v5, 9 }
 0x163   :  { %v4504_v63 = vrot.slane %v4227_v30, %v4082_v51  ;;  %v1482_v44 = vsel %vm1286_vm6, %v4470_v15, %v1481_v2  ;;  %v1412_v0 = vsel %vm1282_vm4, %v4463_v33, %v1411_v62  ;;  %v3319_v55 = vrot.slane %v577_v31, 9 }
 0x164   :  { %v973_v22 = vmax.f32 %v4201_v5, %v5426_v45  ;;  %v974_v9 = vmax.f32 %v4199_v56, %v3318_v34  ;;  %v1483_v8 = vsel %vm1288_vm7, %v4476_v43, %v1482_v44  ;;  %v1413_v36 = vsel %vm1284_vm5, %v4470_v15, %v1412_v0  ;;  %v5428_v45 = vld [vmem:[#allocation20_spill] sm:$0xff]  ;;  %v5429_v44 = vld [vmem:[#allocation18_spill] sm:$0xff]  ;;  %v5430_v0 = vld [vmem:[#allocation17_spill] sm:$0xff] }
 0x165   :  { %v4517_v5 = vrot.slane %v4217_v49, %v4082_v51  ;;  %1549 = vrot.lane.b32.xlu0 %v1451_v27, %s3852_s12  ;;  %v1484_v32 = vsel %vm1290_vm8, %v1374_v52, %v1483_v8  ;;  %v1414_v56 = vsel %vm1286_vm6, %v4476_v43, %v1413_v36  ;;  %v975_v34 = vmax.f32 %v577_v31, %v3319_v55  ;;  %v5427_v49 = vld [vmem:[#allocation16_spill] sm:$0xff] }
 0x166   :  { %v4520_v30 = vrot.slane %v973_v22, %v4082_v51  ;;  %v4527_v2 = vrot.slane %v974_v9, %v4082_v51  ;;  %1519 = vrot.lane.b32.xlu1 %v1484_v32, %s3851_s26  ;;  %v1415_v62 = vsel %vm1288_vm7, %v1374_v52, %v1414_v56  ;;  %v1485_v22 = vsel %vm1391_vm1, %v5428_v45, %v5427_v49 }
 0x167   :  { %v1416_v27 = vsel %vm1391_vm1, %v5429_v44, %v5428_v45  ;;  %v611_v8 = vcombine.high %v5430_v0, %v5430_v0  ;;  %v1452_v31 = vsel %vm1448_vm9, %v1415_v62, 0.0  ;;  %v1378_v55 = vrot.slane %v975_v34, %v4082_v51 }
 0x168   :  { %v1486_v9 = vsel %vm1280_vm3, %v5429_v44, %v1485_v22  ;;  %v1417_v52 = vsel %vm1280_vm3, %v4504_v63, %v1416_v27  ;;  %v3326_v56 = vrot.slane %v5430_v0, 9  ;;  %v5432_v22 = vrot.slane %v5431_v58, 9 }
 0x169   :  { %v1487_v36 = vsel %vm1282_vm4, %v4504_v63, %v1486_v9  ;;  %v1418_v32 = vsel %vm1282_vm4, %v4517_v5, %v1417_v52  ;;  %v3327_v43 = vrot.slane %v611_v8, 9  ;;  %v4559_v27 = vrot.slane %v4261_v37, %v4082_v51 }
 0x16a   :  { %v1488_v62 = vsel %vm1284_vm5, %v4517_v5, %v1487_v36  ;;  %v1419_v34 = vsel %vm1284_vm5, %v4520_v30, %v1418_v32  ;;  %v981_v15 = vmax.f32 %v5431_v58, %v5432_v22  ;;  %1551 = vrot.lane.b32.xlu1 %v1452_v31, %s3852_s12  ;;  %v982_v36 = vmax.f32 %v5430_v0, %v3326_v56  ;;  %v5433_v31 = vld [vmem:[#allocation19_spill] sm:$0xff] }
 0x16b   :  { %v1489_v9 = vsel %vm1286_vm6, %v4520_v30, %v1488_v62  ;;  %v1420_v52 = vsel %vm1286_vm6, %v4527_v2, %v1419_v34  ;;  %v983_v17 = vmax.f32 %v611_v8, %v3327_v43  ;;  %v4569_v32 = vrot.slane %v4378_v7, %v4082_v51 }
 0x16c   :  { %v1490_v58 = vsel %vm1288_vm7, %v4527_v2, %v1489_v9  ;;  %v1421_v37 = vsel %vm1288_vm7, %v1378_v55, %v1420_v52  ;;  %v4576_v22 = vrot.slane %v5433_v31, %v4082_v51  ;;  %v4581_v0 = vrot.slane %v981_v15, %v4082_v51 }
 0x16d   :  { %v1491_v62 = vsel %vm1290_vm8, %v1378_v55, %v1490_v58  ;;  %v1453_v34 = vsel %vm1448_vm9, %v1421_v37, 0.0  ;;  %v4584_v43 = vrot.slane %v982_v36, %v4082_v51  ;;  %v1492_v7 = vsel %vm1391_vm1, %v4264_v54, %v4257_v13 }
 0x16e   :  { %1521 = vrot.lane.b32.xlu0 %v1491_v62, %s3851_s26  ;;  %v1422_v8 = vsel %vm1391_vm1, %v4272_v20, %v4264_v54  ;;  %v645_v55 = vcombine.high %v4254_v21, %v4254_v21  ;;  %v3334_v56 = vrot.slane %v4254_v21, 9  ;;  %v1382_v15 = vrot.slane %v983_v17, %v4082_v51 }
 0x16f   :  { %v1493_v9 = vsel %vm1280_vm3, %v4272_v20, %v1492_v7  ;;  %v1423_v52 = vsel %vm1280_vm3, %v4559_v27, %v1422_v8  ;;  %v5434_v36 = vrot.slane %v4251_v26, 9  ;;  %v4615_v8 = vrot.slane %v4304_v53, %v4082_v51 }
 0x170   :  { %v1494_v37 = vsel %vm1282_vm4, %v4559_v27, %v1493_v9  ;;  %v1424_v31 = vsel %vm1282_vm4, %v4576_v22, %v1423_v52  ;;  %v3335_v62 = vrot.slane %v645_v55, 9  ;;  %v990_v54 = vmax.f32 %v4254_v21, %v3334_v56 }
 0x171   :  { %v989_v58 = vmax.f32 %v4251_v26, %v5434_v36  ;;  %v1495_v17 = vsel %vm1284_vm5, %v4576_v22, %v1494_v37  ;;  %v1425_v7 = vsel %vm1284_vm5, %v4581_v0, %v1424_v31  ;;  %v4619_v26 = vrot.slane %v4266_v11, %v4082_v51 }
 0x172   :  { %1553 = vrot.lane.b32.xlu0 %v1453_v34, %s3852_s12  ;;  %v1496_v9 = vsel %vm1286_vm6, %v4581_v0, %v1495_v17  ;;  %v1426_v21 = vsel %vm1286_vm6, %v4584_v43, %v1425_v7  ;;  %v991_v56 = vmax.f32 %v645_v55, %v3335_v62  ;;  %v1499_v11 = vsel %vm1391_vm1, %v4310_v10, %v4307_v47 }
 0x173   :  { %v4627_v52 = vrot.slane %v989_v58, %v4082_v51  ;;  %v1497_v53 = vsel %vm1288_vm7, %v4584_v43, %v1496_v9  ;;  %v1427_v36 = vsel %vm1288_vm7, %v1382_v15, %v1426_v21  ;;  %v1428_v34 = vsel %vm1391_vm1, %v4342_v25, %v4310_v10 }
 0x174   :  { %v1498_v37 = vsel %vm1290_vm8, %v1382_v15, %v1497_v53  ;;  %v4640_v55 = vrot.slane %v990_v54, %v4082_v51  ;;  %v1386_v58 = vrot.slane %v991_v56, %v4082_v51  ;;  %v1500_v31 = vsel %vm1280_vm3, %v4342_v25, %v1499_v11 }
 0x175   :  { %1523 = vrot.lane.b32.xlu1 %v1498_v37, %s3851_s26  ;;  %v1501_v62 = vsel %vm1282_vm4, %v4615_v8, %v1500_v31  ;;  %v1429_v17 = vsel %vm1280_vm3, %v4615_v8, %v1428_v34  ;;  %v679_v7 = vcombine.high %v4348_v41, %v4348_v41  ;;  %v3342_v15 = vrot.slane %v4348_v41, 9 }
 0x176   :  { %v1502_v54 = vsel %vm1284_vm5, %v4619_v26, %v1501_v62  ;;  %v1430_v9 = vsel %vm1282_vm4, %v4619_v26, %v1429_v17  ;;  %v5435_v21 = vrot.slane %v4350_v19, 9  ;;  %v4662_v53 = vrot.slane %v4386_v48, %v4082_v51 }
 0x177   :  { %v1503_v11 = vsel %vm1286_vm6, %v4627_v52, %v1502_v54  ;;  %v1431_v34 = vsel %vm1284_vm5, %v4627_v52, %v1430_v9  ;;  %v3343_v37 = vrot.slane %v679_v7, 9  ;;  %v998_v31 = vmax.f32 %v4348_v41, %v3342_v15  ;;  %v1598_v15 = vld [vmem:[%s5374_s4 + $0x58] sm:$0xff] }
 0x178   :  { %v997_v56 = vmax.f32 %v4350_v19, %v5435_v21  ;;  %v1454_v62 = vsel %vm1448_vm9, %v1427_v36, 0.0  ;;  %v1504_v17 = vsel %vm1288_vm7, %v4640_v55, %v1503_v11  ;;  %v1432_v19 = vsel %vm1286_vm6, %v4640_v55, %v1431_v34  ;;  %v1597_v36 = vld [vmem:[%s5374_s4 + $0x50] sm:$0xff] }
 0x179   :  { %v4676_v48 = vrot.slane %v4358_v24, %v4082_v51  ;;  %1555 = vrot.lane.b32.xlu1 %v1454_v62, %s3852_s12  ;;  %v1505_v54 = vsel %vm1290_vm8, %v1386_v58, %v1504_v17  ;;  %v1433_v9 = vsel %vm1288_vm7, %v1386_v58, %v1432_v19  ;;  %v999_v21 = vmax.f32 %v679_v7, %v3343_v37 }
 0x17a   :  { %v4682_v41 = vrot.slane %v997_v56, %v4082_v51  ;;  %1525 = vrot.lane.b32.xlu0 %v1505_v54, %s3851_s26  ;;  %v4692_v24 = vrot.slane %v998_v31, %v4082_v51  ;;  %v1506_v58 = vsel %vm1391_vm1, %v4392_v18, %v4389_v3  ;;  %v1434_v7 = vsel %vm1391_vm1, %v4569_v32, %v4392_v18 }
 0x17b   :  { %v1281_v56 = vsel %vm1280_vm3, %v4127_v40, %v4115_v29  ;;  %v1455_v11 = vsel %vm1448_vm9, %v1433_v9, 0.0  ;;  %v1507_v34 = vsel %vm1280_vm3, %v4569_v32, %v1506_v58  ;;  %v1435_v37 = vsel %vm1280_vm3, %v4662_v53, %v1434_v7  ;;  %v5436_v7 = vld [vmem:[#allocation22_spill] sm:$0xff] }
 0x17c   :  { %v1283_v31 = vsel %vm1282_vm4, %v4276_v16, %v1281_v56  ;;  %v1508_v62 = vsel %vm1282_vm4, %v4662_v53, %v1507_v34  ;;  %v1436_v17 = vsel %vm1282_vm4, %v4676_v48, %v1435_v37  ;;  %v3633_v40 = vpack.c.bf16 %v1598_v15, %v1597_v36  ;;  %v5437_v56 = vld [vmem:[#allocation13_spill] sm:$0xff] }
 0x17d   :  { %v1285_v29 = vsel %vm1284_vm5, %v4279_v50, %v1283_v31  ;;  %v1390_v19 = vrot.slane %v999_v21, %v4082_v51  ;;  %v1509_v54 = vsel %vm1284_vm5, %v4676_v48, %v1508_v62  ;;  %v1437_v9 = vsel %vm1284_vm5, %v4682_v41, %v1436_v17 }
 0x17e   :  { %v1287_v16 = vsel %vm1286_vm6, %v4283_v42, %v1285_v29  ;;  %1557 = vrot.lane.b32.xlu0 %v1455_v11, %s3852_s12  ;;  %v1510_v58 = vsel %vm1286_vm6, %v4682_v41, %v1509_v54  ;;  %v1438_v50 = vsel %vm1286_vm6, %v4692_v24, %v1437_v9  ;;  %3634 = vmatprep.subr.bf16.mxu1 %v3633_v40  ;;  %v5438_v11 = vld [vmem:[#allocation14_spill] sm:$0xff]  ;;  %v5443_v9 = vld [vmem:[#allocation21_spill] sm:$0xff]  ;;  %vm1569_vm13 = vcmask 261120  }
 0x17f   :  { %v1289_v21 = vsel %vm1288_vm7, %v4286_v1, %v1287_v16  ;;  %v1511_v36 = vsel %vm1288_vm7, %v4692_v24, %v1510_v58  ;;  %v1439_v15 = vsel %vm1288_vm7, %v1390_v19, %v1438_v50  ;;  %3636 = vmatpush3.bf16.msra.mxu1 %v3633_v40  ;;  %v1292_v34 = vsel %vm1280_vm3, %v5438_v11, %v5437_v56  ;;  %v5442_v54 = vld [vmem:[#allocation26_spill] sm:$0xff] }
 0x180   :  { %v1291_v42 = vsel %vm1290_vm8, %v5436_v7, %v1289_v21  ;;  %v1512_v37 = vsel %vm1290_vm8, %v1390_v19, %v1511_v36  ;;  %v1456_v31 = vsel %vm1448_vm9, %v1439_v15, 0.0  ;;  %v1293_v1 = vsel %vm1282_vm4, %v4148_v12, %v1292_v34 }
 0x181   :  { %1527 = vrot.lane.b32.xlu1 %v1512_v37, %s3851_s26  ;;  %v1294_v62 = vsel %vm1284_vm5, %v4355_v57, %v1293_v1  ;;  %v1298_v17 = vsel %vm1280_vm3, %v4183_v4, %v4179_v61  ;;  %v1304_v29 = vsel %vm1280_vm3, %v4206_v6, %v4196_v60  ;;  %v1310_v40 = vsel %vm1280_vm3, %v5428_v45, %v5427_v49  ;;  %v5440_v45 = vld [vmem:[#allocation25_spill] sm:$0xff] }
 0x182   :  { %v1295_v12 = vsel %vm1286_vm6, %v4362_v28, %v1294_v62  ;;  %v1299_v19 = vsel %vm1282_vm4, %v4187_v59, %v1298_v17  ;;  %v1305_v57 = vsel %vm1282_vm4, %v4210_v38, %v1304_v29  ;;  %v1311_v61 = vsel %vm1282_vm4, %v5429_v44, %v1310_v40  ;;  %v5441_v44 = vld [vmem:[#allocation24_spill] sm:$0xff] }
 0x183   :  { %v1296_v4 = vsel %vm1288_vm7, %v4365_v35, %v1295_v12  ;;  %v1300_v60 = vsel %vm1284_vm5, %v4410_v14, %v1299_v19  ;;  %v1306_v6 = vsel %vm1284_vm5, %v4454_v46, %v1305_v57  ;;  %v1312_v28 = vsel %vm1284_vm5, %v4504_v63, %v1311_v61  ;;  %v5439_v14 = vld [vmem:[#allocation23_spill] sm:$0xff] }
 0x184   :  { %v1297_v59 = vsel %vm1290_vm8, %v4368_v23, %v1296_v4  ;;  %v1301_v38 = vsel %vm1286_vm6, %v4418_v39, %v1300_v60  ;;  %v1307_v49 = vsel %vm1286_vm6, %v4463_v33, %v1306_v6  ;;  %v1313_v35 = vsel %vm1286_vm6, %v4517_v5, %v1312_v28 }
 0x185   :  { %1559 = vrot.lane.b32.xlu1 %v1456_v31, %s3852_s12  ;;  %v1302_v46 = vsel %vm1288_vm7, %v5439_v14, %v1301_v38  ;;  %v1308_v63 = vsel %vm1288_vm7, %v5440_v45, %v1307_v49  ;;  %v1314_v23 = vsel %vm1288_vm7, %v4520_v30, %v1313_v35  ;;  %v1316_v16 = vsel %vm1280_vm3, %v5443_v9, %v4257_v13 }
 0x186   :  { %v1303_v39 = vsel %vm1290_vm8, %v5441_v44, %v1302_v46  ;;  %v1309_v33 = vsel %vm1290_vm8, %v5442_v54, %v1308_v63  ;;  %v1315_v5 = vsel %vm1290_vm8, %v4527_v2, %v1314_v23  ;;  %v1317_v58 = vsel %vm1282_vm4, %v4272_v20, %v1316_v16  ;;  %v2393_v54 = vld [vmem:[#allocation2 + $0x8] sm:$0xff]  ;;  %v2395_v16 = vld [vmem:[#allocation2 + $0x18] sm:$0xff] }
 0x187   :  { %v1318_v50 = vsel %vm1284_vm5, %v4559_v27, %v1317_v58  ;;  %v1322_v30 = vsel %vm1280_vm3, %v4310_v10, %v4307_v47  ;;  %v1328_v21 = vsel %vm1280_vm3, %v4392_v18, %v4389_v3  ;;  %vm1578_vm14 = vcmask 523264  }
 0x188   :  { %v1319_v2 = vsel %vm1286_vm6, %v4576_v22, %v1318_v50  ;;  %v1323_v13 = vsel %vm1282_vm4, %v4342_v25, %v1322_v30  ;;  %v1329_v20 = vsel %vm1282_vm4, %v4569_v32, %v1328_v21  ;;  %vm1599_vm15 = vcmask 785408   ;;  %v2396_v50 = vld [vmem:[#allocation2 + $0x20] sm:$0xff]  ;;  %v2397_v30 = vld [vmem:[#allocation2 + $0x28] sm:$0xff] }
 0x189   :  { %v1320_v27 = vsel %vm1288_vm7, %v4581_v0, %v1319_v2  ;;  %v1324_v36 = vsel %vm1284_vm5, %v4615_v8, %v1323_v13  ;;  %v1330_v47 = vsel %vm1284_vm5, %v4662_v53, %v1329_v20  ;;  %v1343_v8 = vsel %vm1342_vm12, 0.0, %v1291_v42  ;;  %v2398_v2 = vld [vmem:[#allocation2 + $0x30] sm:$0xff]  ;;  %v2399_v13 = vld [vmem:[#allocation2 + $0x38] sm:$0xff] }
 0x18a   :  { %v1321_v3 = vsel %vm1290_vm8, %v4584_v43, %v1320_v27  ;;  %v1325_v10 = vsel %vm1286_vm6, %v4619_v26, %v1324_v36  ;;  %v1331_v25 = vsel %vm1286_vm6, %v4676_v48, %v1330_v47  ;;  %v1345_v42 = vsel %vm1342_vm12, 0.0, %v1303_v39  ;;  %v2392_v39 = vld [vmem:[#allocation2] sm:$0xff]  ;;  %v2401_v36 = vld [vmem:[#allocation2 + $0x48] sm:$0xff] }
 0x18b   :  { %v1326_v18 = vsel %vm1288_vm7, %v4627_v52, %v1325_v10  ;;  %v1332_v32 = vsel %vm1288_vm7, %v4682_v41, %v1331_v25  ;;  %v1346_v31 = vsel %vm1342_vm12, 0.0, %v1309_v33  ;;  %v1347_v40 = vsel %vm1342_vm12, 0.0, %v1315_v5  ;;  %v2394_v33 = vld [vmem:[#allocation2 + $0x10] sm:$0xff]  ;;  %v2400_v27 = vld [vmem:[#allocation2 + $0x40] sm:$0xff]  ;;  %v2403_v10 = vld [vmem:[#allocation2 + $0x58] sm:$0xff] }
 0x18c   :  { %v1327_v22 = vsel %vm1290_vm8, %v4640_v55, %v1326_v18  ;;  %v1333_v0 = vsel %vm1290_vm8, %v4692_v24, %v1332_v32  ;;  %v1344_v55 = vsel %vm1342_vm12, 0.0, %v1297_v59  ;;  %v1348_v4 = vsel %vm1342_vm12, 0.0, %v1321_v3  ;;  %v2402_v3 = vld [vmem:[#allocation2 + $0x50] sm:$0xff]  ;;  %v2404_v18 = vld [vmem:[#allocation2 + $0x60] sm:$0xff]  ;;  %v2405_v32 = vld [vmem:[#allocation2 + $0x68] sm:$0xff] }
 0x18d   :  { %v1349_v38 = vsel %vm1342_vm12, 0.0, %v1327_v22  ;;  %v1350_v45 = vsel %vm1342_vm12, 0.0, %v1333_v0  ;;  %v3853_v5 = vmov 0.0|0.0   ;;  %v3638_v9 = vpack.c.bf16 %v2393_v54, %v2392_v39  ;;  %v2406_v0 = vld [vmem:[#allocation2 + $0x70] sm:$0xff] }
 0x18e   :  { %3637 = vmatprep.subr.bf16.mxu0 %v3853_v5  ;;  %v3641_v58 = vpack.c.bf16 %v2395_v16, %v2394_v33  ;;  %v3644_v21 = vpack.c.bf16 %v2397_v30, %v2396_v50  ;;  %v3647_v20 = vpack.c.bf16 %v2399_v13, %v2398_v2  ;;  %v3650_v47 = vpack.c.bf16 %v2401_v36, %v2400_v27 }
 0x18f   :  { %3639 = vmatpush1.bf16.msra.mxu0 %v3638_v9  ;;  %v3653_v25 = vpack.c.bf16 %v2403_v10, %v2402_v3  ;;  %v3656_v22 = vpack.c.bf16 %v2405_v32, %v2404_v18  ;;  %vm2303_vm9 = vcmask 1042432  }
 0x190   :  { %3640 = vmatprep.subr.bf16.mxu0 %v3853_v5 }
 0x193   :  { %3642 = vmatpush1.bf16.msra.mxu0 %v3641_v58 }
 0x194   :  { %3643 = vmatprep.subr.bf16.mxu0 %v3853_v5 }
 0x197   :  { %3645 = vmatpush1.bf16.msra.mxu0 %v3644_v21 }
 0x198   :  { %3646 = vmatprep.subr.bf16.mxu0 %v3853_v5 }
 0x19b   :  { %3648 = vmatpush1.bf16.msra.mxu0 %v3647_v20 }
 0x19c   :  { %3649 = vmatprep.subr.bf16.mxu0 %v3853_v5 }
 0x19f   :  { %3651 = vmatpush1.bf16.msra.mxu0 %v3650_v47 }
 0x1a0   :  { %3652 = vmatprep.subr.bf16.mxu0 %v3853_v5 }
 0x1a3   :  { %3654 = vmatpush1.bf16.msra.mxu0 %v3653_v25 }
 0x1a4   :  { %3655 = vmatprep.subr.bf16.mxu0 %v3853_v5 }
 0x1a7   :  { %3657 = vmatpush1.bf16.msra.mxu0 %v3656_v22 }
 0x1a8   :  { %3658 = vmatprep.subr.bf16.mxu0 %v3853_v5 }
 0x1bd   :  { %v1514_v43 = vpop.permute.xlu0 %1513 }
 0x1be   :  { %v1570_v26 = vsel %vm1569_vm13, %v1343_v8, %v1514_v43  ;;  %v1546_v53 = vpop.permute.xlu1 %1545  ;;  %v2407_v43 = vld [vmem:[#allocation2 + $0x78] sm:$0xff] }
 0x1bf   :  { %v1579_v52 = vsel %vm1578_vm14, %v1570_v26, %v1546_v53  ;;  %v3659_v8 = vpack.c.bf16 %v2407_v43, %v2406_v0  ;;  %v2408_v26 = vld [vmem:[#allocation2 + $0x80] sm:$0xff]  ;;  %v2409_v53 = vld [vmem:[#allocation2 + $0x88] sm:$0xff] }
 0x1c0   :  { %3560 = vmatprep.mubr.msk.f32.mxu1 %vm1599_vm15, %v1579_v52  ;;  %v3662_v52 = vpack.c.bf16 %v2409_v53, %v2408_v26 }
 0x1c1   :  { %3660 = vmatpush1.bf16.msra.mxu0 %v3659_v8 }
 0x1c2   :  { %3661 = vmatprep.subr.bf16.mxu0 %v3853_v5 }
 0x1c5   :  { %3663 = vmatpush1.bf16.msra.mxu0 %v3662_v52 }
 0x1c6   :  { %3664 = vmatprep.subr.bf16.mxu0 %v3853_v5 }
 0x1cb   :  { %v1516_v48 = vpop.permute.xlu0 %1515 }
 0x1cc   :  { %v1571_v41 = vsel %vm1569_vm13, %v1344_v55, %v1516_v48  ;;  %v1548_v24 = vpop.permute.xlu1 %1547  ;;  %v2410_v48 = vld [vmem:[#allocation2 + $0x90] sm:$0xff]  ;;  %v2411_v55 = vld [vmem:[#allocation2 + $0x98] sm:$0xff] }
 0x1cd   :  { %v1580_v15 = vsel %vm1578_vm14, %v1571_v41, %v1548_v24  ;;  %v3665_v41 = vpack.c.bf16 %v2411_v55, %v2410_v48  ;;  %v2412_v24 = vld [vmem:[#allocation2 + $0xa0] sm:$0xff] }
 0x1ce   :  { %3561 = vmatmul.mubr.msk.f32.vlgmr.msra.gmra.mrb[0].mxu1 %vm1599_vm15, %v1580_v15  ;;  %v2413_v15 = vld [vmem:[#allocation2 + $0xa8] sm:$0xff] }
 0x1cf   :  { %3666 = vmatpush1.bf16.msra.mxu0 %v3665_v41 }
 0x1d0   :  { %3667 = vmatprep.subr.bf16.mxu0 %v3853_v5 }
 0x1d3   :  { %v1518_v7 = vpop.permute.xlu0 %1517 }
 0x1d4   :  { %v1572_v56 = vsel %vm1569_vm13, %v1345_v42, %v1518_v7  ;;  %v3668_v7 = vpack.c.bf16 %v2413_v15, %v2412_v24  ;;  %v4877_v42 = vld [vmem:[%s5375_s5] ss:$0 sm:$0xff] }
 0x1d6   :  { %3669 = vmatpush1.bf16.msra.mxu0 %v3668_v7 }
 0x1d7   :  { %v1550_v11 = vpop.permute.xlu0 %1549  ;;  %3670 = vmatprep.subr.bf16.mxu0 %v3853_v5 }
 0x1d8   :  { %v1581_v34 = vsel %vm1578_vm14, %v1572_v56, %v1550_v11  ;;  %v1520_v37 = vpop.permute.xlu1 %1519  ;;  %v4882_v11 = vld [vmem:[%s5376_s6] ss:$0 sm:$0xff] }
 0x1d9   :  { %3563 = vmatprep.mubr.msk.f32.mxu1 %vm1599_vm15, %v1581_v34  ;;  %v1573_v1 = vsel %vm1569_vm13, %v1346_v31, %v1520_v37 }
 0x1dc   :  { %v1552_v62 = vpop.permute.xlu1 %1551 }
 0x1dd   :  { %v1582_v17 = vsel %vm1578_vm14, %v1573_v1, %v1552_v62 }
 0x1de   :  { %3564 = vmatmul.mubr.msk.f32.gmra.mrb[2].mxu1 %vm1599_vm15, %v1582_v17 }
 0x1e0   :  { %v1522_v29 = vpop.permute.xlu0 %1521 }
 0x1e1   :  { %v1574_v12 = vsel %vm1569_vm13, %v1347_v40, %v1522_v29 }
 0x1e4   :  { %v1554_v19 = vpop.permute.xlu0 %1553 }
 0x1e5   :  { %v1583_v57 = vsel %vm1578_vm14, %v1574_v12, %v1554_v19  ;;  %v5444_v19 = vld [vmem:[#allocation12_spill] sm:$0xff] }
 0x1e6   :  { %3566 = vmatprep.mubr.msk.f32.mxu1 %vm1599_vm15, %v1583_v57 }
 0x1e7   :  { %v1524_v61 = vpop.permute.xlu1 %1523 }
 0x1e8   :  { %v1575_v60 = vsel %vm1569_vm13, %v1348_v4, %v1524_v61 }
 0x1eb   :  { %v1556_v6 = vpop.permute.xlu1 %1555 }
 0x1ec   :  { %v1584_v28 = vsel %vm1578_vm14, %v1575_v60, %v1556_v6  ;;  %v1526_v59 = vpop.permute.xlu0 %1525 }
 0x1ed   :  { %3567 = vmatmul.mubr.msk.f32.gmra.mrb[4].mxu1 %vm1599_vm15, %v1584_v28  ;;  %v1576_v49 = vsel %vm1569_vm13, %v1349_v38, %v1526_v59  ;;  %v2414_v38 = vld [vmem:[#allocation2 + $0xb0] sm:$0xff] }
 0x1f0   :  { %v1558_v35 = vpop.permute.xlu0 %1557 }
 0x1f1   :  { %v1585_v14 = vsel %vm1578_vm14, %v1576_v49, %v1558_v35  ;;  %v2415_v49 = vld [vmem:[#allocation2 + $0xb8] sm:$0xff] }
 0x1f2   :  { %3569 = vmatprep.mubr.msk.f32.mxu1 %vm1599_vm15, %v1585_v14 }
 0x1f3   :  { %v1528_v46 = vpop.permute.xlu1 %1527 }
 0x1f4   :  { %v1577_v63 = vsel %vm1569_vm13, %v1350_v45, %v1528_v46  ;;  %v3671_v45 = vpack.c.bf16 %v2415_v49, %v2414_v38 }
 0x1f6   :  { %3672 = vmatpush1.bf16.msra.mxu0 %v3671_v45 }
 0x1f7   :  { %v1560_v23 = vpop.permute.xlu1 %1559 }
 0x1f8   :  { %v1586_v44 = vsel %vm1578_vm14, %v1577_v63, %v1560_v23 }
 0x1f9   :  { %3570 = vmatmul.mubr.msk.f32.gmra.mrb[6].mxu1 %vm1599_vm15, %v1586_v44 }
 0x2a1   :  { %v3562_v56 = vpop.f32.mrb[0].mxu1 }
 0x2a2   :  { %v1737_v34 = vmul.f32 %v3562_v56, %v4877_v42  ;;  %v1690_v37 = vpop.f32.mrb[1].mxu1 }
 0x2a3   :  { %v1736_v31 = vmul.f32 %v4877_v42, %v1690_v37 }
 0x2a4   :  { %v1752_v1 = vadd.f32 %v4882_v11, %v1737_v34 }
 0x2a5   :  { %v1751_v62 = vadd.f32 %v4882_v11, %v1736_v31 }
 0x2a6   :  { %vm1760_vm0 = vcmp.gt.f32.partialorder %v1752_v1, 0.0  ;;  %v1768_v17 = vmul.f32 0.2, %v1752_v1 }
 0x2a7   :  { %vm1759_vm2 = vcmp.gt.f32.partialorder %v1751_v62, 0.0  ;;  %v1767_v29 = vmul.f32 0.2, %v1751_v62 }
 0x2a8   :  { %v1776_v40 = vsel %vm1760_vm0, %v1752_v1, %v1768_v17 }
 0x2a9   :  { %v1808_v12 = vcombine.high %v1776_v40, %v1776_v40  ;;  %v1815_v57 = vrot.slane %v1776_v40, %v5444_v19  ;;  %v1775_v61 = vsel %vm1759_vm2, %v1751_v62, %v1767_v29 }
 0x2aa   :  { %v1791_v4 = vcombine.high %v1775_v61, %v1775_v61  ;;  %v1798_v60 = vrot.slane %v1775_v61, %v5444_v19 }
 0x2ab   :  { %v1822_v6 = vrot.slane %v1808_v12, %v5444_v19  ;;  %v1823_v28 = vcombine.high %v1815_v57, %v1815_v57  ;;  %v3358_v59 = vrot.slane %v1815_v57, 9 }
 0x2ac   :  { %v1805_v35 = vrot.slane %v1791_v4, %v5444_v19  ;;  %v1806_v14 = vcombine.high %v1798_v60, %v1798_v60  ;;  %v3354_v46 = vrot.slane %v1798_v60, 9 }
 0x2ad   :  { %v3359_v63 = vrot.slane %v1823_v28, 9  ;;  %v2059_v23 = vmax.f32 %v1815_v57, %v3358_v59  ;;  %v1824_v44 = vcombine.high %v1822_v6, %v1822_v6  ;;  %v3360_v39 = vrot.slane %v1822_v6, 9 }
 0x2ae   :  { %v3355_v54 = vrot.slane %v1806_v14, 9  ;;  %v2055_v33 = vmax.f32 %v1798_v60, %v3354_v46  ;;  %v1807_v9 = vcombine.high %v1805_v35, %v1805_v35  ;;  %v3356_v16 = vrot.slane %v1805_v35, 9 }
 0x2af   :  { %v3361_v58 = vrot.slane %v1824_v44, 9  ;;  %v2060_v50 = vmax.f32 %v1823_v28, %v3359_v63  ;;  %v2061_v30 = vmax.f32 %v1822_v6, %v3360_v39  ;;  %v2126_v21 = vrot.slane %v2059_v23, %v4082_v51 }
 0x2b0   :  { %v3357_v13 = vrot.slane %v1807_v9, 9  ;;  %v2056_v20 = vmax.f32 %v1806_v14, %v3355_v54  ;;  %v2057_v27 = vmax.f32 %v1805_v35, %v3356_v16  ;;  %v4894_v36 = vrot.slane %v2055_v33, %v4082_v51 }
 0x2b1   :  { %v3565_v2 = vpop.f32.mrb[2].mxu1  ;;  %v2062_v10 = vmax.f32 %v1824_v44, %v3361_v58  ;;  %v2130_v25 = vrot.slane %v2060_v50, %v4082_v51  ;;  %v2134_v18 = vrot.slane %v2061_v30, %v4082_v51 }
 0x2b2   :  { %v1739_v47 = vmul.f32 %v3565_v2, %v4877_v42  ;;  %v1700_v3 = vpop.f32.mrb[3].mxu1  ;;  %v2058_v22 = vmax.f32 %v1807_v9, %v3357_v13  ;;  %v4901_v0 = vrot.slane %v2056_v20, %v4082_v51  ;;  %v4904_v43 = vrot.slane %v2057_v27, %v4082_v51 }
 0x2b3   :  { %v1738_v32 = vmul.f32 %v4877_v42, %v1700_v3  ;;  %v2254_v26 = vrot.slane %v2062_v10, %v4082_v51  ;;  %v2315_v53 = vsel %vm1391_vm1, %v2130_v25, %v2126_v21  ;;  %v2281_v52 = vsel %vm1391_vm1, %v2134_v18, %v2130_v25 }
 0x2b4   :  { %v1754_v8 = vadd.f32 %v4882_v11, %v1739_v47  ;;  %v2316_v55 = vsel %vm1280_vm3, %v2134_v18, %v2315_v53  ;;  %v2250_v41 = vrot.slane %v2058_v22, %v4082_v51  ;;  %v2312_v24 = vsel %vm1391_vm1, %v4901_v0, %v4894_v36 }
 0x2b5   :  { %v1753_v48 = vadd.f32 %v4882_v11, %v1738_v32  ;;  %v2317_v7 = vsel %vm1282_vm4, %v2254_v26, %v2316_v55  ;;  %v2313_v56 = vsel %vm1280_vm3, %v4904_v43, %v2312_v24  ;;  %v2279_v31 = vsel %vm1391_vm1, %v4904_v43, %v4901_v0 }
 0x2b6   :  { %vm1762_vm10 = vcmp.gt.f32.partialorder %v1754_v8, 0.0  ;;  %v1770_v15 = vmul.f32 0.2, %v1754_v8  ;;  %2338 = vrot.lane.b32.xlu1 %v2317_v7, %s3852_s12  ;;  %v2314_v37 = vsel %vm1282_vm4, %v2250_v41, %v2313_v56  ;;  %v2280_v62 = vsel %vm1280_vm3, %v2250_v41, %v2279_v31 }
 0x2b7   :  { %vm1761_vm11 = vcmp.gt.f32.partialorder %v1753_v48, 0.0  ;;  %v1769_v34 = vmul.f32 0.2, %v1753_v48  ;;  %2336 = vrot.lane.b32.xlu0 %v2314_v37, %s3852_s12  ;;  %v2282_v17 = vsel %vm1280_vm3, %v2254_v26, %v2281_v52  ;;  %v2209_v29 = vsel %vm1280_vm3, %v2130_v25, %v2126_v21 }
 0x2b8   :  { %v1778_v1 = vsel %vm1762_vm10, %v1754_v8, %v1770_v15  ;;  %v2304_v61 = vsel %vm2303_vm9, %v2280_v62, 0.0  ;;  %v2305_v6 = vsel %vm2303_vm9, %v2282_v17, 0.0  ;;  %v4933_v28 = vsel %vm1282_vm4, %v2134_v18, %v2209_v29 }
 0x2b9   :  { %v1842_v40 = vcombine.high %v1778_v1, %v1778_v1  ;;  %v1849_v12 = vrot.slane %v1778_v1, %v5444_v19  ;;  %v1777_v57 = vsel %vm1761_vm11, %v1753_v48, %v1769_v34  ;;  %v3387_v35 = vcombine.low %v2304_v61, %v2305_v6 }
 0x2ba   :  { %v1825_v4 = vcombine.high %v1777_v57, %v1777_v57  ;;  %v1832_v60 = vrot.slane %v1777_v57, %v5444_v19  ;;  %v2207_v62 = vsel %vm1280_vm3, %v4901_v0, %v4894_v36 }
 0x2bb   :  { %v1856_v59 = vrot.slane %v1842_v40, %v5444_v19  ;;  %v1857_v38 = vcombine.high %v1849_v12, %v1849_v12  ;;  %v3366_v49 = vrot.slane %v1849_v12, 9  ;;  %3394 = vmatprep.mubr.msk.f32.mxu0 %vm1578_vm14, %v3387_v35 }
 0x2bc   :  { %v1839_v14 = vrot.slane %v1825_v4, %v5444_v19  ;;  %v1840_v46 = vcombine.high %v1832_v60, %v1832_v60  ;;  %v3362_v45 = vrot.slane %v1832_v60, 9 }
 0x2bd   :  { %v3367_v63 = vrot.slane %v1857_v38, 9  ;;  %v2067_v23 = vmax.f32 %v1849_v12, %v3366_v49  ;;  %v1858_v44 = vcombine.high %v1856_v59, %v1856_v59  ;;  %v3368_v39 = vrot.slane %v1856_v59, 9 }
 0x2be   :  { %v3363_v54 = vrot.slane %v1840_v46, 9  ;;  %v2063_v33 = vmax.f32 %v1832_v60, %v3362_v45  ;;  %v1841_v9 = vcombine.high %v1839_v14, %v1839_v14  ;;  %v3364_v16 = vrot.slane %v1839_v14, 9 }
 0x2bf   :  { %v3369_v50 = vrot.slane %v1858_v44, 9  ;;  %v2068_v30 = vmax.f32 %v1857_v38, %v3367_v63  ;;  %v2069_v21 = vmax.f32 %v1856_v59, %v3368_v39  ;;  %v4939_v2 = vrot.slane %v2067_v23, %v4082_v51 }
 0x2c0   :  { %v3568_v58 = vpop.f32.mrb[4].mxu1  ;;  %v3365_v27 = vrot.slane %v1841_v9, 9  ;;  %v2064_v47 = vmax.f32 %v1840_v46, %v3363_v54  ;;  %v2065_v3 = vmax.f32 %v1839_v14, %v3364_v16  ;;  %v4951_v26 = vrot.slane %v2063_v33, %v4082_v51 }
 0x2c1   :  { %v1741_v13 = vmul.f32 %v3568_v58, %v4877_v42  ;;  %v1710_v20 = vpop.f32.mrb[5].mxu1  ;;  %v2070_v25 = vmax.f32 %v1858_v44, %v3369_v50  ;;  %v4944_v18 = vrot.slane %v2068_v30, %v4082_v51  ;;  %v4947_v32 = vrot.slane %v2069_v21, %v4082_v51 }
 0x2c2   :  { %v1740_v10 = vmul.f32 %v4877_v42, %v1710_v20  ;;  %v2066_v8 = vmax.f32 %v1841_v9, %v3365_v27  ;;  %v4954_v53 = vrot.slane %v2064_v47, %v4082_v51  ;;  %v4964_v41 = vrot.slane %v2065_v3, %v4082_v51 }
 0x2c3   :  { %v1756_v22 = vadd.f32 %v4882_v11, %v1741_v13  ;;  %v4958_v48 = vrot.slane %v2070_v25, %v4082_v51  ;;  %v2321_v55 = vsel %vm1391_vm1, %v4944_v18, %v4939_v2  ;;  %v4989_v60 = vsel %vm1282_vm4, %v4904_v43, %v2207_v62 }
 0x2c4   :  { %v1755_v52 = vadd.f32 %v4882_v11, %v1740_v10  ;;  %v2322_v15 = vsel %vm1280_vm3, %v4947_v32, %v2321_v55  ;;  %v2258_v7 = vrot.slane %v2066_v8, %v4082_v51  ;;  %v2318_v37 = vsel %vm1391_vm1, %v4954_v53, %v4951_v26 }
 0x2c5   :  { %vm1764_vm13 = vcmp.gt.f32.partialorder %v1756_v22, 0.0  ;;  %v1772_v24 = vmul.f32 0.2, %v1756_v22  ;;  %v2323_v34 = vsel %vm1282_vm4, %v4958_v48, %v2322_v15  ;;  %v2319_v1 = vsel %vm1280_vm3, %v4964_v41, %v2318_v37 }
 0x2c6   :  { %vm1763_vm15 = vcmp.gt.f32.partialorder %v1755_v52, 0.0  ;;  %v1771_v56 = vmul.f32 0.2, %v1755_v52  ;;  %2342 = vrot.lane.b32.xlu1 %v2323_v34, %s3852_s12  ;;  %v2283_v17 = vsel %vm1391_vm1, %v4964_v41, %v4954_v53  ;;  %v2320_v57 = vsel %vm1282_vm4, %v2258_v7, %v2319_v1 }
 0x2c7   :  { %v1780_v31 = vsel %vm1764_vm13, %v1756_v22, %v1772_v24  ;;  %2340 = vrot.lane.b32.xlu0 %v2320_v57, %s3852_s12  ;;  %v4992_v36 = vsel %vm1280_vm3, %v2258_v7, %v2283_v17  ;;  %v4999_v14 = vsel %vm1391_vm1, %v4947_v32, %v4944_v18 }
 0x2c8   :  { %v1876_v29 = vcombine.high %v1780_v31, %v1780_v31  ;;  %v1883_v40 = vrot.slane %v1780_v31, %v5444_v19  ;;  %v1779_v12 = vsel %vm1763_vm15, %v1755_v52, %v1771_v56 }
 0x2c9   :  { %v1859_v61 = vcombine.high %v1779_v12, %v1779_v12  ;;  %v1866_v4 = vrot.slane %v1779_v12, %v5444_v19 }
 0x2ca   :  { %v1890_v0 = vrot.slane %v1876_v29, %v5444_v19  ;;  %v1891_v6 = vcombine.high %v1883_v40, %v1883_v40  ;;  %v3374_v59 = vrot.slane %v1883_v40, 9 }
 0x2cb   :  { %v1873_v38 = vrot.slane %v1859_v61, %v5444_v19  ;;  %v1874_v49 = vcombine.high %v1866_v4, %v1866_v4  ;;  %v3370_v35 = vrot.slane %v1866_v4, 9 }
 0x2cc   :  { %v3375_v46 = vrot.slane %v1891_v6, 9  ;;  %v2075_v45 = vmax.f32 %v1883_v40, %v3374_v59  ;;  %v3571_v43 = vpop.f32.mrb[6].mxu1  ;;  %v1892_v63 = vcombine.high %v1890_v0, %v1890_v0  ;;  %v3376_v23 = vrot.slane %v1890_v0, 9 }
 0x2cd   :  { %v3371_v44 = vrot.slane %v1874_v49, 9  ;;  %v2071_v39 = vmax.f32 %v1866_v4, %v3370_v35  ;;  %v1743_v54 = vmul.f32 %v3571_v43, %v4877_v42  ;;  %v1720_v33 = vpop.f32.mrb[7].mxu1  ;;  %v1875_v9 = vcombine.high %v1873_v38, %v1873_v38 }
 0x2ce   :  { %v1742_v16 = vmul.f32 %v4877_v42, %v1720_v33  ;;  %v3377_v58 = vrot.slane %v1892_v63, 9  ;;  %v2076_v50 = vmax.f32 %v1891_v6, %v3375_v46  ;;  %v2077_v30 = vmax.f32 %v1890_v0, %v3376_v23 }
 0x2cf   :  { %v1758_v21 = vadd.f32 %v4882_v11, %v1743_v54  ;;  %v5005_v13 = vrot.slane %v2075_v45, %v4082_v51  ;;  %v3372_v20 = vrot.slane %v1873_v38, 9  ;;  %v3373_v27 = vrot.slane %v1875_v9, 9 }
 0x2d0   :  { %v1757_v47 = vadd.f32 %v4882_v11, %v1742_v16  ;;  %v2078_v3 = vmax.f32 %v1892_v63, %v3377_v58  ;;  %v5009_v10 = vrot.slane %v2076_v50, %v4082_v51  ;;  %v5012_v25 = vrot.slane %v2077_v30, %v4082_v51 }
 0x2d1   :  { %vm1766_vm0 = vcmp.gt.f32.partialorder %v1758_v21, 0.0  ;;  %v1774_v42 = vmul.f32 0.2, %v1758_v21  ;;  %v2072_v22 = vmax.f32 %v1874_v49, %v3371_v44  ;;  %v2073_v8 = vmax.f32 %v1873_v38, %v3372_v20 }
 0x2d2   :  { %vm1765_vm2 = vcmp.gt.f32.partialorder %v1757_v47, 0.0  ;;  %v1773_v52 = vmul.f32 0.2, %v1757_v47  ;;  %v5015_v55 = vrot.slane %v2078_v3, %v4082_v51  ;;  %v2327_v11 = vsel %vm1391_vm1, %v5009_v10, %v5005_v13 }
 0x2d3   :  { %v1782_v24 = vsel %vm1766_vm0, %v1758_v21, %v1774_v42  ;;  %v2328_v15 = vsel %vm1280_vm3, %v5012_v25, %v2327_v11  ;;  %v2074_v7 = vmax.f32 %v1875_v9, %v3373_v27  ;;  %v5023_v56 = vrot.slane %v2071_v39, %v4082_v51 }
 0x2d4   :  { %v1910_v34 = vcombine.high %v1782_v24, %v1782_v24  ;;  %v1917_v37 = vrot.slane %v1782_v24, %v5444_v19  ;;  %v1781_v31 = vsel %vm1765_vm2, %v1757_v47, %v1773_v52  ;;  %v2329_v1 = vsel %vm1282_vm4, %v5015_v55, %v2328_v15 }
 0x2d5   :  { %v1893_v62 = vcombine.high %v1781_v31, %v1781_v31  ;;  %v1900_v17 = vrot.slane %v1781_v31, %v5444_v19  ;;  %2346 = vrot.lane.b32.xlu1 %v2329_v1, %s3852_s12  ;;  %v2166_v29 = vrot.slane %v2072_v22, %v4082_v51  ;;  %v2170_v40 = vrot.slane %v2073_v8, %v4082_v51 }
 0x2d6   :  { %v1924_v12 = vrot.slane %v1910_v34, %v5444_v19  ;;  %v1925_v57 = vcombine.high %v1917_v37, %v1917_v37  ;;  %v3382_v61 = vrot.slane %v1917_v37, 9  ;;  %v2266_v4 = vrot.slane %v2074_v7, %v4082_v51 }
 0x2d7   :  { %v1907_v0 = vrot.slane %v1893_v62, %v5444_v19  ;;  %v1908_v6 = vcombine.high %v1900_v17, %v1900_v17  ;;  %v3378_v59 = vrot.slane %v1900_v17, 9  ;;  %v2324_v38 = vsel %vm1391_vm1, %v2166_v29, %v5023_v56 }
 0x2d8   :  { %v3383_v49 = vrot.slane %v1925_v57, 9  ;;  %v2083_v35 = vmax.f32 %v1917_v37, %v3382_v61  ;;  %v2325_v46 = vsel %vm1280_vm3, %v2170_v40, %v2324_v38  ;;  %v1926_v45 = vcombine.high %v1924_v12, %v1924_v12 }
 0x2d9   :  { %v3379_v43 = vrot.slane %v1908_v6, 9  ;;  %v2079_v63 = vmax.f32 %v1900_v17, %v3378_v59  ;;  %v2326_v23 = vsel %vm1282_vm4, %v2266_v4, %v2325_v46  ;;  %v3384_v44 = vrot.slane %v1924_v12, 9 }
 0x2da   :  { %2344 = vrot.lane.b32.xlu0 %v2326_v23, %s3852_s12  ;;  %v3385_v39 = vrot.slane %v1926_v45, 9  ;;  %v2084_v54 = vmax.f32 %v1925_v57, %v3383_v49  ;;  %v2198_v33 = vrot.slane %v2083_v35, %v4082_v51  ;;  %v1909_v9 = vcombine.high %v1907_v0, %v1907_v0 }
 0x2db   :  { %v2085_v16 = vmax.f32 %v1924_v12, %v3384_v44  ;;  %v3380_v58 = vrot.slane %v1907_v0, 9  ;;  %v2080_v50 = vmax.f32 %v1908_v6, %v3379_v43  ;;  %v2186_v30 = vrot.slane %v2079_v63, %v4082_v51 }
 0x2dc   :  { %v2086_v21 = vmax.f32 %v1926_v45, %v3385_v39  ;;  %v2202_v20 = vrot.slane %v2084_v54, %v4082_v51  ;;  %v3381_v27 = vrot.slane %v1909_v9, 9  ;;  %v2286_v47 = vsel %vm1280_vm3, %v4958_v48, %v4999_v14 }
 0x2dd   :  { %v2206_v3 = vrot.slane %v2085_v16, %v4082_v51  ;;  %v2081_v42 = vmax.f32 %v1907_v0, %v3380_v58  ;;  %v2190_v22 = vrot.slane %v2080_v50, %v4082_v51  ;;  %v2306_v8 = vsel %vm2303_vm9, %v4992_v36, 0.0 }
 0x2de   :  { %v2278_v52 = vrot.slane %v2086_v21, %v4082_v51  ;;  %v2333_v11 = vsel %vm1391_vm1, %v2202_v20, %v2198_v33  ;;  %v2082_v24 = vmax.f32 %v1909_v9, %v3381_v27  ;;  %v2307_v15 = vsel %vm2303_vm9, %v2286_v47, 0.0 }
 0x2df   :  { %v2334_v7 = vsel %vm1280_vm3, %v2206_v3, %v2333_v11  ;;  %v2194_v34 = vrot.slane %v2081_v42, %v4082_v51  ;;  %v2330_v48 = vsel %vm1391_vm1, %v2190_v22, %v2186_v30  ;;  %v3389_v14 = vcombine.low %v2306_v8, %v2307_v15 }
 0x2e0   :  { %v2335_v37 = vsel %vm1282_vm4, %v2278_v52, %v2334_v7  ;;  %v2274_v31 = vrot.slane %v2082_v24, %v4082_v51  ;;  %v2213_v36 = vsel %vm1280_vm3, %v4944_v18, %v4939_v2  ;;  %v2211_v1 = vsel %vm1280_vm3, %v4954_v53, %v4951_v26 }
 0x2e1   :  { %2350 = vrot.lane.b32.xlu1 %v2335_v37, %s3852_s12  ;;  %v2331_v62 = vsel %vm1280_vm3, %v2194_v34, %v2330_v48  ;;  %v2214_v17 = vsel %vm1282_vm4, %v4947_v32, %v2213_v36  ;;  %v2212_v12 = vsel %vm1282_vm4, %v4964_v41, %v2211_v1  ;;  %v2287_v57 = vsel %vm1391_vm1, %v2170_v40, %v2166_v29  ;;  %v2904_v48 = vld [vmem:[%s5380_s10 + $0x18] sm:$0xff]  ;;  %v2906_v36 = vld [vmem:[%s5380_s10 + $0x28] sm:$0xff] }
 0x2e2   :  { %v2332_v61 = vsel %vm1282_vm4, %v2274_v31, %v2331_v62  ;;  %v2288_v2 = vsel %vm1280_vm3, %v2266_v4, %v2287_v57  ;;  %v2289_v18 = vsel %vm1391_vm1, %v5012_v25, %v5009_v10  ;;  %v2217_v32 = vsel %vm1280_vm3, %v5009_v10, %v5005_v13  ;;  %v2908_v1 = vld [vmem:[%s5380_s10 + $0x38] sm:$0xff]  ;;  %v2905_v57 = vld [vmem:[%s5380_s10 + $0x20] sm:$0xff] }
 0x2e3   :  { %2348 = vrot.lane.b32.xlu0 %v2332_v61, %s3852_s12  ;;  %v2308_v26 = vsel %vm2303_vm9, %v2288_v2, 0.0  ;;  %v2215_v53 = vsel %vm1280_vm3, %v2166_v29, %v5023_v56  ;;  %v2290_v41 = vsel %vm1280_vm3, %v5015_v55, %v2289_v18  ;;  %v2218_v4 = vsel %vm1282_vm4, %v5012_v25, %v2217_v32  ;;  %v2907_v61 = vld [vmem:[%s5380_s10 + $0x30] sm:$0xff]  ;;  %v2910_v2 = vld [vmem:[%s5380_s10 + $0x48] sm:$0xff]  ;;  %v2912_v18 = vld [vmem:[%s5380_s10 + $0x58] sm:$0xff] }
 0x2e4   :  { %v2216_v0 = vsel %vm1282_vm4, %v2170_v40, %v2215_v53  ;;  %v2291_v6 = vsel %vm1391_vm1, %v2194_v34, %v2190_v22  ;;  %v2309_v59 = vsel %vm2303_vm9, %v2290_v41, 0.0  ;;  %v2293_v13 = vsel %vm1391_vm1, %v2206_v3, %v2202_v20  ;;  %v2909_v53 = vld [vmem:[%s5380_s10 + $0x40] sm:$0xff]  ;;  %v2911_v41 = vld [vmem:[%s5380_s10 + $0x50] sm:$0xff] }
 0x2e5   :  { %v2292_v38 = vsel %vm1280_vm3, %v2274_v31, %v2291_v6  ;;  %v3391_v49 = vcombine.low %v2308_v26, %v2309_v59  ;;  %v2221_v56 = vsel %vm1280_vm3, %v2202_v20, %v2198_v33  ;;  %v2294_v55 = vsel %vm1280_vm3, %v2278_v52, %v2293_v13  ;;  %v2903_v31 = vld [vmem:[%s5380_s10 + $0x10] sm:$0xff]  ;;  %v2918_v13 = vld [vmem:[%s5380_s10 + $0x88] sm:$0xff] }
 0x2e6   :  { %v2310_v10 = vsel %vm2303_vm9, %v2292_v38, 0.0  ;;  %v2222_v29 = vsel %vm1282_vm4, %v2206_v3, %v2221_v56  ;;  %v2219_v25 = vsel %vm1280_vm3, %v2190_v22, %v2186_v30  ;;  %v2311_v40 = vsel %vm2303_vm9, %v2294_v55, 0.0  ;;  %v2913_v38 = vld [vmem:[%s5380_s10 + $0x60] sm:$0xff] }
 0x2e7   :  { %v2220_v35 = vsel %vm1282_vm4, %v2194_v34, %v2219_v25  ;;  %v3393_v46 = vcombine.low %v2310_v10, %v2311_v40  ;;  %v2232_v45 = vsel %vm1342_vm12, 0.0, %v4933_v28  ;;  %v2231_v23 = vsel %vm1342_vm12, 0.0, %v4989_v60  ;;  %v2902_v34 = vld [vmem:[%s5380_s10 + $0x8] sm:$0xff]  ;;  %v2920_v10 = vld [vmem:[%s5380_s10 + $0x98] sm:$0xff]  ;;  %v2919_v25 = vld [vmem:[%s5380_s10 + $0x90] sm:$0xff] }
 0x2e8   :  { %v2234_v33 = vsel %vm1342_vm12, 0.0, %v2214_v17  ;;  %v2233_v28 = vsel %vm1342_vm12, 0.0, %v2212_v12  ;;  %v2236_v21 = vsel %vm1342_vm12, 0.0, %v2218_v4  ;;  %v2235_v27 = vsel %vm1342_vm12, 0.0, %v2216_v0  ;;  %v2914_v4 = vld [vmem:[%s5380_s10 + $0x68] sm:$0xff]  ;;  %v2916_v0 = vld [vmem:[%s5380_s10 + $0x78] sm:$0xff] }
 0x2e9   :  { %v2238_v22 = vsel %vm1342_vm12, 0.0, %v2222_v29  ;;  %v2237_v11 = vsel %vm1342_vm12, 0.0, %v2220_v35  ;;  %v3673_v37 = vpack.c.bf16 %v2904_v48, %v2902_v34  ;;  %v3854_v62 = vmov 0.0   ;;  %v2917_v29 = vld [vmem:[%s5380_s10 + $0x80] sm:$0xff]  ;;  %v2922_v40 = vld [vmem:[%s5380_s10 + $0xa8] sm:$0xff]  ;;  %v2924_v35 = vld [vmem:[%s5380_s10 + $0xb8] sm:$0xff] }
 0x2ea   :  { %3032 = vmatprep.mubr.f32.mxu1 %v3854_v62  ;;  %v3677_v12 = vpack.c.bf16 %v2908_v1, %v2906_v36  ;;  %v3679_v26 = vpack.c.bf16 %v2907_v61, %v2905_v57  ;;  %v3681_v32 = vpack.c.bf16 %v2912_v18, %v2910_v2  ;;  %v3683_v6 = vpack.c.bf16 %v2911_v41, %v2909_v53  ;;  %v3064_v36 = vld [vmem:[#allocation5 + $0xb8] sm:$0xff]  ;;  %v3047_v57 = vld [vmem:[#allocation5 + $0x30] sm:$0xff]  ;;  %v3065_v2 = vld [vmem:[#allocation5 + $0xc0] sm:$0xff] }
 0x2eb   :  { %3674 = vmatprep.subr.bf16.mxu1 %v3673_v37  ;;  %v3685_v59 = vpack.c.bf16 %v2916_v0, %v2914_v4  ;;  %v3689_v55 = vpack.c.bf16 %v2920_v10, %v2918_v13  ;;  %v3046_v37 = vld [vmem:[#allocation5 + $0x28] sm:$0xff]  ;;  %v3048_v61 = vld [vmem:[#allocation5 + $0x38] sm:$0xff]  ;;  %v3049_v53 = vld [vmem:[#allocation5 + $0x40] sm:$0xff]  ;;  %vm2835_vm9 = vcmask 1041408  }
 0x2ec   :  { %v3066_v18 = vld [vmem:[#allocation5 + $0xc8] sm:$0xff]  ;;  %v3067_v4 = vld [vmem:[#allocation5 + $0xd0] sm:$0xff]  ;;  %v3068_v0 = vld [vmem:[#allocation5 + $0xd8] sm:$0xff] }
 0x2ed   :  { %v3050_v41 = vld [vmem:[#allocation5 + $0x48] sm:$0xff]  ;;  %v3069_v13 = vld [vmem:[#allocation5 + $0xe0] sm:$0xff] }
 0x2ee   :  { %v3070_v10 = vld [vmem:[#allocation5 + $0xe8] sm:$0xff] }
 0x328   :  { %v2339_v43 = vpop.permute.xlu1 %2338 }
 0x329   :  { %v2361_v63 = vsel %vm1578_vm14, %v2232_v45, %v2339_v43  ;;  %v2337_v44 = vpop.permute.xlu0 %2336  ;;  %v3693_v45 = vpack.c.bf16 %v2924_v35, %v2922_v40  ;;  %v2921_v43 = vld [vmem:[%s5380_s10 + $0xa0] sm:$0xff] }
 0x32a   :  { %v2360_v39 = vsel %vm1578_vm14, %v2231_v23, %v2337_v44  ;;  %v2926_v23 = vld [vmem:[%s5380_s10 + $0xc8] sm:$0xff]  ;;  %v2928_v44 = vld [vmem:[%s5380_s10 + $0xd8] sm:$0xff]  ;;  %v5226_v40 = vld [vmem:[%s5379_s9] ss:$0 sm:$0xff] }
 0x32b   :  { %v3386_v54 = vcombine.low %v2360_v39, %v2361_v63  ;;  %v2923_v63 = vld [vmem:[%s5380_s10 + $0xb0] sm:$0xff]  ;;  %v2925_v39 = vld [vmem:[%s5380_s10 + $0xc0] sm:$0xff] }
 0x32d   :  { %2501 = vmatmul.mubr.f32.vlgmr.msra.gmra.mrb[16].mxu0 %v3386_v54  ;;  %v3695_v54 = vpack.c.bf16 %v2923_v63, %v2921_v43 }
 0x32e   :  { %3395 = vmatprep.mubr.msk.f32.mxu0 %vm1578_vm14, %v3389_v14  ;;  %v2901_v14 = vld [vmem:[%s5380_s10] sm:$0xff] }
 0x32f   :  { %v3675_v17 = vpack.c.bf16 %v2903_v31, %v2901_v14  ;;  %v3045_v14 = vld [vmem:[#allocation5 + $0x20] sm:$0xff]  ;;  %v3063_v31 = vld [vmem:[#allocation5 + $0xb0] sm:$0xff] }
 0x331   :  { %3676 = vmatpush1.bf16.msra.mxu1 %v3675_v17  ;;  %v3715_v17 = vpack.c.bf16 %v3046_v37, %v3045_v14 }
 0x332   :  { %3678 = vmatprep.subr.bf16.mxu1 %v3677_v12  ;;  %v3717_v12 = vpack.c.bf16 %v3064_v36, %v3063_v31 }
 0x335   :  { %3680 = vmatpush1.bf16.msra.mxu1 %v3679_v26  ;;  %v3719_v26 = vpack.c.bf16 %v3048_v61, %v3047_v57 }
 0x336   :  { %3682 = vmatprep.subr.bf16.mxu1 %v3681_v32  ;;  %v3721_v32 = vpack.c.bf16 %v3066_v18, %v3065_v2 }
 0x338   :  { %v2343_v9 = vpop.permute.xlu1 %2342 }
 0x339   :  { %v2363_v16 = vsel %vm1578_vm14, %v2234_v33, %v2343_v9  ;;  %v2341_v58 = vpop.permute.xlu0 %2340  ;;  %3684 = vmatpush1.bf16.msra.mxu1 %v3683_v6  ;;  %v2927_v33 = vld [vmem:[%s5380_s10 + $0xd0] sm:$0xff]  ;;  %v2930_v9 = vld [vmem:[%s5380_s10 + $0xe8] sm:$0xff]  ;;  %v3723_v6 = vpack.c.bf16 %v3050_v41, %v3049_v53 }
 0x33a   :  { %v2362_v50 = vsel %vm1578_vm14, %v2233_v28, %v2341_v58  ;;  %3686 = vmatprep.subr.bf16.mxu1 %v3685_v59  ;;  %v3697_v28 = vpack.c.bf16 %v2928_v44, %v2926_v23  ;;  %v3057_v58 = vld [vmem:[#allocation5 + $0x80] sm:$0xff]  ;;  %v3725_v59 = vpack.c.bf16 %v3068_v0, %v3067_v4 }
 0x33b   :  { %v3388_v30 = vcombine.low %v2362_v50, %v2363_v16  ;;  %v2932_v16 = vld [vmem:[%s5380_s10 + $0xf8] sm:$0xff]  ;;  %v3058_v50 = vld [vmem:[#allocation5 + $0x88] sm:$0xff] }
 0x33d   :  { %2506 = vmatmul.mubr.f32.gmra.mrb[18].mxu0 %v3388_v30  ;;  %v3041_v30 = vld [vmem:[#allocation5] sm:$0xff] }
 0x33e   :  { %3396 = vmatprep.mubr.msk.f32.mxu0 %vm1578_vm14, %v3391_v49  ;;  %v2915_v49 = vld [vmem:[%s5380_s10 + $0x70] sm:$0xff] }
 0x33f   :  { %v3687_v56 = vpack.c.bf16 %v2915_v49, %v2913_v38  ;;  %v3051_v38 = vld [vmem:[#allocation5 + $0x50] sm:$0xff]  ;;  %v3052_v49 = vld [vmem:[#allocation5 + $0x58] sm:$0xff] }
 0x341   :  { %3688 = vmatpush1.bf16.msra.mxu1 %v3687_v56  ;;  %v3727_v56 = vpack.c.bf16 %v3052_v49, %v3051_v38 }
 0x342   :  { %3690 = vmatprep.subr.bf16.mxu1 %v3689_v55  ;;  %v3729_v55 = vpack.c.bf16 %v3070_v10, %v3069_v13 }
 0x347   :  { %v2347_v60 = vpop.permute.xlu1 %2346 }
 0x348   :  { %v2365_v20 = vsel %vm1578_vm14, %v2236_v21, %v2347_v60  ;;  %v3705_v60 = vpack.c.bf16 %v3058_v50, %v3057_v58  ;;  %v3042_v21 = vld [vmem:[#allocation5 + $0x8] sm:$0xff] }
 0x34a   :  { %3706 = vmatprep.subr.bf16.mxu0 %v3705_v60 }
 0x34c   :  { %v2345_v47 = vpop.permute.xlu0 %2344 }
 0x34d   :  { %v2364_v3 = vsel %vm1578_vm14, %v2235_v27, %v2345_v47  ;;  %v3060_v27 = vld [vmem:[#allocation5 + $0x98] sm:$0xff]  ;;  %v3707_v47 = vpack.c.bf16 %v3042_v21, %v3041_v30 }
 0x34e   :  { %v3390_v42 = vcombine.low %v2364_v3, %v2365_v20  ;;  %v3059_v20 = vld [vmem:[#allocation5 + $0x90] sm:$0xff] }
 0x34f   :  { %v3709_v3 = vpack.c.bf16 %v3060_v27, %v3059_v20  ;;  %3708 = vmatpush3.bf16.msra.mxu0 %v3707_v47 }
 0x350   :  { %2511 = vmatmul.mubr.f32.gmra.mrb[20].mxu0 %v3390_v42  ;;  %v3043_v42 = vld [vmem:[#allocation5 + $0x10] sm:$0xff] }
 0x351   :  { %3397 = vmatprep.mubr.msk.f32.mxu0 %vm1578_vm14, %v3393_v46  ;;  %v3691_v46 = vpack.c.bf16 %v2919_v25, %v2917_v29  ;;  %3710 = vmatprep.subr.bf16.mxu0 %v3709_v3  ;;  %v5221_v29 = vld [vmem:[%s5378_s8] ss:$0 sm:$0xff] }
 0x353   :  { %v2351_v8 = vpop.permute.xlu1 %2350  ;;  %3692 = vmatpush1.bf16.msra.mxu1 %v3691_v46 }
 0x354   :  { %v2367_v52 = vsel %vm1578_vm14, %v2238_v22, %v2351_v8  ;;  %3694 = vmatprep.subr.bf16.mxu1 %v3693_v45  ;;  %v3044_v22 = vld [vmem:[#allocation5 + $0x18] sm:$0xff]  ;;  %v3061_v8 = vld [vmem:[#allocation5 + $0xa0] sm:$0xff] }
 0x355   :  { %v2349_v24 = vpop.permute.xlu0 %2348  ;;  %v3711_v34 = vpack.c.bf16 %v3044_v22, %v3043_v42 }
 0x356   :  { %v2366_v15 = vsel %vm1578_vm14, %v2237_v11, %v2349_v24  ;;  %v3062_v11 = vld [vmem:[#allocation5 + $0xa8] sm:$0xff]  ;;  %v3701_v24 = vpack.c.bf16 %v2932_v16, %v2930_v9 }
 0x357   :  { %v3392_v7 = vcombine.low %v2366_v15, %v2367_v52  ;;  %3696 = vmatpush1.bf16.msra.mxu1 %v3695_v54  ;;  %v3699_v52 = vpack.c.bf16 %v2927_v33, %v2925_v39  ;;  %v2929_v15 = vld [vmem:[%s5380_s10 + $0xe0] sm:$0xff]  ;;  %v3713_v48 = vpack.c.bf16 %v3062_v11, %v3061_v8  ;;  %3712 = vmatpush3.bf16.msra.mxu0 %v3711_v34 }
 0x358   :  { %3698 = vmatprep.subr.bf16.mxu1 %v3697_v28 }
 0x359   :  { %2516 = vmatmul.mubr.f32.gmra.mrb[22].mxu0 %v3392_v7  ;;  %v2931_v7 = vld [vmem:[%s5380_s10 + $0xf0] sm:$0xff]  ;;  %3714 = vmatprep.subr.bf16.mxu0 %v3713_v48 }
 0x35a   :  { %v3703_v1 = vpack.c.bf16 %v2931_v7, %v2929_v15 }
 0x35b   :  { %3700 = vmatpush1.bf16.msra.mxu1 %v3699_v52  ;;  %3716 = vmatpush3.bf16.msra.mxu0 %v3715_v17 }
 0x35c   :  { %3702 = vmatprep.subr.bf16.mxu1 %v3701_v24  ;;  %3718 = vmatprep.subr.bf16.mxu0 %v3717_v12 }
 0x35f   :  { %3704 = vmatpush1.bf16.msra.mxu1 %v3703_v1  ;;  %3720 = vmatpush3.bf16.msra.mxu0 %v3719_v26 }
 0x360   :  { %3737 = vmatprep.subr.bf16.mxu1 %v3853_v5  ;;  %3722 = vmatprep.subr.bf16.mxu0 %v3721_v32 }
 0x363   :  { %3724 = vmatpush3.bf16.msra.mxu0 %v3723_v6 }
 0x364   :  { %3726 = vmatprep.subr.bf16.mxu0 %v3725_v59 }
 0x367   :  { %3728 = vmatpush3.bf16.msra.mxu0 %v3727_v56 }
 0x368   :  { %3730 = vmatprep.subr.bf16.mxu0 %v3729_v55 }
 0x400   :  { %v2502_v25 = vpop.f32.mrb[16].mxu0 }
 0x401   :  { %v2525_v35 = vcombine.high %v2502_v25, %v2502_v25  ;;  %v2540_v46 = vmul.f32 %v5221_v29, %v2502_v25  ;;  %v2504_v45 = vpop.f32.mrb[17].mxu0 }
 0x403   :  { %v2541_v43 = vmul.f32 %v5221_v29, %v2525_v35  ;;  %v2555_v63 = vadd.f32 %v5226_v40, %v2540_v46 }
 0x405   :  { %v2556_v23 = vadd.f32 %v5226_v40, %v2541_v43  ;;  %vm2563_vm12 = vcmp.gt.f32.partialorder %v2555_v63, 0.0  ;;  %v2571_v44 = vmul.f32 0.2, %v2555_v63 }
 0x407   :  { %vm2564_vm14 = vcmp.gt.f32.partialorder %v2556_v23, 0.0  ;;  %v2572_v39 = vmul.f32 0.2, %v2556_v23  ;;  %v2579_v54 = vsel %vm2563_vm12, %v2555_v63, %v2571_v44 }
 0x408   :  { %v2601_v33 = vrot.slane %v2579_v54, %v5444_v19 }
 0x409   :  { %v2580_v9 = vsel %vm2564_vm14, %v2556_v23, %v2572_v39 }
 0x40a   :  { %v2602_v16 = vcombine.high %v2601_v33, %v2601_v33  ;;  %v2609_v28 = vrot.slane %v2580_v9, %v5444_v19  ;;  %v3400_v58 = vrot.slane %v2601_v33, 9 }
 0x40c   :  { %v2610_v50 = vcombine.high %v2609_v28, %v2609_v28  ;;  %v3401_v30 = vrot.slane %v2602_v16, 9  ;;  %v3402_v60 = vrot.slane %v2609_v28, 9  ;;  %v2723_v21 = vmax.f32 %v2601_v33, %v3400_v58 }
 0x40e   :  { %v3403_v20 = vrot.slane %v2610_v50, 9  ;;  %v2724_v27 = vmax.f32 %v2602_v16, %v3401_v30  ;;  %v2725_v47 = vmax.f32 %v2609_v28, %v3402_v60  ;;  %v2758_v42 = vrot.slane %v2723_v21, %v4082_v51 }
 0x410   :  { %v2726_v3 = vmax.f32 %v2610_v50, %v3403_v20  ;;  %v2762_v22 = vrot.slane %v2724_v27, %v4082_v51  ;;  %v2507_v8 = vpop.f32.mrb[18].mxu0  ;;  %v2766_v15 = vrot.slane %v2725_v47, %v4082_v51 }
 0x411   :  { %v2526_v52 = vcombine.high %v2507_v8, %v2507_v8  ;;  %v2542_v11 = vmul.f32 %v5221_v29, %v2507_v8  ;;  %v2509_v24 = vpop.f32.mrb[19].mxu0 }
 0x412   :  { %v2770_v7 = vrot.slane %v2726_v3, %v4082_v51  ;;  %v2819_v34 = vsel %vm1391_vm1, %v2762_v22, %v2758_v42 }
 0x413   :  { %v2836_v48 = vsel %vm2835_vm9, %v2819_v34, 0.0  ;;  %v2543_v14 = vmul.f32 %v5221_v29, %v2526_v52  ;;  %v2557_v37 = vadd.f32 %v5226_v40, %v2542_v11 }
 0x414   :  { %v2820_v31 = vsel %vm1391_vm1, %v2770_v7, %v2766_v15  ;;  %v2837_v36 = vrot.slane %v2836_v48, 4 }
 0x415   :  { %v2843_v1 = vsel %vm2835_vm9, %v2820_v31, 0.0  ;;  %v2558_v17 = vadd.f32 %v5226_v40, %v2543_v14  ;;  %vm2565_vm10 = vcmp.gt.f32.partialorder %v2557_v37, 0.0  ;;  %v2573_v12 = vmul.f32 0.2, %v2557_v37 }
 0x416   :  { %v2838_v57 = vadd.f32 %v2837_v36, %v2836_v48  ;;  %v2844_v61 = vrot.slane %v2843_v1, 4 }
 0x417   :  { %vm2566_vm11 = vcmp.gt.f32.partialorder %v2558_v17, 0.0  ;;  %v2574_v2 = vmul.f32 0.2, %v2558_v17  ;;  %v2581_v18 = vsel %vm2565_vm10, %v2557_v37, %v2573_v12 }
 0x418   :  { %v2845_v26 = vadd.f32 %v2844_v61, %v2843_v1  ;;  %v2617_v32 = vrot.slane %v2581_v18, %v5444_v19  ;;  %v2839_v53 = vrot.slane %v2838_v57, 2 }
 0x419   :  { %v2582_v41 = vsel %vm2566_vm11, %v2558_v17, %v2574_v2 }
 0x41a   :  { %v2846_v4 = vrot.slane %v2845_v26, 2  ;;  %v2618_v0 = vcombine.high %v2617_v32, %v2617_v32  ;;  %v2625_v6 = vrot.slane %v2582_v41, %v5444_v19  ;;  %v3404_v59 = vrot.slane %v2617_v32, 9 }
 0x41b   :  { %v2840_v56 = vadd.f32 %v2839_v53, %v2838_v57 }
 0x41c   :  { %v2847_v38 = vadd.f32 %v2846_v4, %v2845_v26  ;;  %v2626_v49 = vcombine.high %v2625_v6, %v2625_v6  ;;  %v3405_v13 = vrot.slane %v2618_v0, 9  ;;  %v3406_v10 = vrot.slane %v2625_v6, 9 }
 0x41d   :  { %v2727_v55 = vmax.f32 %v2617_v32, %v3404_v59  ;;  %v2841_v54 = vrot.slane %v2840_v56, 1 }
 0x41e   :  { %v3407_v25 = vrot.slane %v2626_v49, 9  ;;  %v2728_v35 = vmax.f32 %v2618_v0, %v3405_v13  ;;  %v2729_v46 = vmax.f32 %v2625_v6, %v3406_v10  ;;  %v2848_v45 = vrot.slane %v2847_v38, 1 }
 0x41f   :  { %v2774_v63 = vrot.slane %v2727_v55, %v4082_v51  ;;  %v2842_v3 = vadd.f32 %v2841_v54, %v2840_v56 }
 0x420   :  { %v2730_v43 = vmax.f32 %v2626_v49, %v3407_v25  ;;  %v2778_v23 = vrot.slane %v2728_v35, %v4082_v51  ;;  %v2782_v44 = vrot.slane %v2729_v46, %v4082_v51  ;;  %v2849_v30 = vadd.f32 %v2848_v45, %v2847_v38 }
 0x421   :  { %v2893_v48 = vmul.f32 0.5, %v2842_v3 }
 0x422   :  { %v2786_v33 = vrot.slane %v2730_v43, %v4082_v51  ;;  %v2821_v9 = vsel %vm1391_vm1, %v2778_v23, %v2774_v63  ;;  %v2894_v11 = vmul.f32 0.5, %v2849_v30 }
 0x423   :  { %v2512_v39 = vpop.f32.mrb[20].mxu0  ;;  %v2850_v50 = vsel %vm2835_vm9, %v2821_v9, 0.0 }
 0x424   :  { %v2527_v16 = vcombine.high %v2512_v39, %v2512_v39  ;;  %v2544_v28 = vmul.f32 %v5221_v29, %v2512_v39  ;;  %v2514_v58 = vpop.f32.mrb[21].mxu0  ;;  %v2822_v60 = vsel %vm1391_vm1, %v2786_v33, %v2782_v44  ;;  %v2851_v21 = vrot.slane %v2850_v50, 4 }
 0x425   :  { %v2857_v47 = vsel %vm2835_vm9, %v2822_v60, 0.0  ;;  %v2953_v2 = vrot.slane %v2894_v11, 7 }
 0x426   :  { %v2545_v20 = vmul.f32 %v5221_v29, %v2527_v16  ;;  %v2559_v27 = vadd.f32 %v5226_v40, %v2544_v28  ;;  %v2852_v42 = vadd.f32 %v2851_v21, %v2850_v50  ;;  %v2858_v22 = vrot.slane %v2857_v47, 4 }
 0x427   :  { %v2954_v45 = vsel %vm1391_vm1, %v2953_v2, %v2893_v48 }
 0x428   :  { %v2560_v8 = vadd.f32 %v5226_v40, %v2545_v20  ;;  %vm2567_vm13 = vcmp.gt.f32.partialorder %v2559_v27, 0.0  ;;  %v2575_v52 = vmul.f32 0.2, %v2559_v27  ;;  %v2853_v24 = vrot.slane %v2852_v42, 2 }
 0x429   :  { %v2859_v7 = vadd.f32 %v2858_v22, %v2857_v47 }
 0x42a   :  { %vm2568_vm15 = vcmp.gt.f32.partialorder %v2560_v8, 0.0  ;;  %v2576_v15 = vmul.f32 0.2, %v2560_v8  ;;  %v2583_v34 = vsel %vm2567_vm13, %v2559_v27, %v2575_v52  ;;  %v2854_v14 = vadd.f32 %v2853_v24, %v2852_v42 }
 0x42b   :  { %v2633_v31 = vrot.slane %v2583_v34, %v5444_v19  ;;  %v2860_v1 = vrot.slane %v2859_v7, 2 }
 0x42c   :  { %v2584_v37 = vsel %vm2568_vm15, %v2560_v8, %v2576_v15  ;;  %v2517_v36 = vpop.f32.mrb[22].mxu0  ;;  %v2855_v32 = vrot.slane %v2854_v14, 1 }
 0x42d   :  { %v2641_v17 = vrot.slane %v2584_v37, %v5444_v19  ;;  %v2528_v12 = vcombine.high %v2517_v36, %v2517_v36  ;;  %v2546_v57 = vmul.f32 %v5221_v29, %v2517_v36  ;;  %v2519_v61 = vpop.f32.mrb[23].mxu0  ;;  %v2634_v18 = vcombine.high %v2633_v31, %v2633_v31 }
 0x42e   :  { %v3408_v26 = vrot.slane %v2633_v31, 9  ;;  %v2861_v53 = vadd.f32 %v2860_v1, %v2859_v7  ;;  %v2856_v49 = vadd.f32 %v2855_v32, %v2854_v14 }
 0x42f   :  { %v2642_v41 = vcombine.high %v2641_v17, %v2641_v17  ;;  %v3410_v4 = vrot.slane %v2641_v17, 9  ;;  %v2547_v0 = vmul.f32 %v5221_v29, %v2528_v12  ;;  %v2561_v6 = vadd.f32 %v5226_v40, %v2546_v57 }
 0x430   :  { %v3409_v59 = vrot.slane %v2634_v18, 9  ;;  %v2731_v38 = vmax.f32 %v2633_v31, %v3408_v26  ;;  %v2862_v13 = vrot.slane %v2861_v53, 1  ;;  %v2895_v39 = vmul.f32 0.5, %v2856_v49 }
 0x431   :  { %v3411_v10 = vrot.slane %v2642_v41, 9  ;;  %v2733_v56 = vmax.f32 %v2641_v17, %v3410_v4  ;;  %v2562_v55 = vadd.f32 %v5226_v40, %v2547_v0  ;;  %vm2569_vm0 = vcmp.gt.f32.partialorder %v2561_v6, 0.0 }
 0x432   :  { %v2732_v25 = vmax.f32 %v2634_v18, %v3409_v59  ;;  %v2577_v35 = vmul.f32 0.2, %v2561_v6  ;;  %v2863_v46 = vadd.f32 %v2862_v13, %v2861_v53  ;;  %v2790_v63 = vrot.slane %v2731_v38, %v4082_v51 }
 0x433   :  { %v2734_v43 = vmax.f32 %v2642_v41, %v3411_v10  ;;  %vm2570_vm2 = vcmp.gt.f32.partialorder %v2562_v55, 0.0  ;;  %v2578_v29 = vmul.f32 0.2, %v2562_v55  ;;  %v2798_v33 = vrot.slane %v2733_v56, %v4082_v51 }
 0x434   :  { %v2794_v23 = vrot.slane %v2732_v25, %v4082_v51  ;;  %v2585_v44 = vsel %vm2569_vm0, %v2561_v6, %v2577_v35  ;;  %v2896_v54 = vmul.f32 0.5, %v2863_v46  ;;  %v2955_v50 = vrot.slane %v2895_v39, 6 }
 0x435   :  { %v2802_v40 = vrot.slane %v2734_v43, %v4082_v51  ;;  %v2586_v9 = vsel %vm2570_vm2, %v2562_v55, %v2578_v29  ;;  %v2649_v16 = vrot.slane %v2585_v44, %v5444_v19 }
 0x436   :  { %v2823_v28 = vsel %vm1391_vm1, %v2794_v23, %v2790_v63  ;;  %v2657_v58 = vrot.slane %v2586_v9, %v5444_v19  ;;  %v2957_v30 = vrot.slane %v2896_v54, 5  ;;  %v2956_v24 = vsel %vm1280_vm3, %v2955_v50, %v2954_v45  ;;  %v3053_v50 = vld [vmem:[#allocation5 + $0x60] sm:$0xff] }
 0x437   :  { %v2864_v60 = vsel %vm2835_vm9, %v2823_v28, 0.0  ;;  %v2650_v21 = vcombine.high %v2649_v16, %v2649_v16  ;;  %v3412_v20 = vrot.slane %v2649_v16, 9  ;;  %v2824_v27 = vsel %vm1391_vm1, %v2802_v40, %v2798_v33 }
 0x438   :  { %v2865_v47 = vrot.slane %v2864_v60, 4  ;;  %v2658_v3 = vcombine.high %v2657_v58, %v2657_v58  ;;  %v3414_v42 = vrot.slane %v2657_v58, 9  ;;  %v2871_v22 = vsel %vm2835_vm9, %v2824_v27, 0.0  ;;  %v3055_v27 = vld [vmem:[#allocation5 + $0x70] sm:$0xff] }
 0x439   :  { %v3413_v8 = vrot.slane %v2650_v21, 9  ;;  %v2735_v52 = vmax.f32 %v2649_v16, %v3412_v20  ;;  %v2872_v11 = vrot.slane %v2871_v22, 4  ;;  %v2958_v34 = vsel %vm1282_vm4, %v2957_v30, %v2956_v24  ;;  %v3054_v30 = vld [vmem:[#allocation5 + $0x68] sm:$0xff]  ;;  %v3072_v20 = vld [vmem:[#allocation5 + $0xf8] sm:$0xff] }
 0x43a   :  { %v3415_v15 = vrot.slane %v2658_v3, 9  ;;  %v2737_v19 = vmax.f32 %v2657_v58, %v3414_v42  ;;  %v2866_v7 = vadd.f32 %v2865_v47, %v2864_v60  ;;  %v3731_v60 = vpack.c.bf16 %v3054_v30, %v3053_v50  ;;  %v3154_v24 = vld [vmem:[%s5384_s14 + $0x18] sm:$0xff] }
 0x43b   :  { %v2736_v48 = vmax.f32 %v2650_v21, %v3413_v8  ;;  %v2873_v14 = vadd.f32 %v2872_v11, %v2871_v22  ;;  %v2806_v36 = vrot.slane %v2735_v52, %v4082_v51  ;;  %v3071_v21 = vld [vmem:[#allocation5 + $0xf0] sm:$0xff]  ;;  %v3151_v22 = vld [vmem:[%s5384_s14] sm:$0xff]  ;;  %v3152_v8 = vld [vmem:[%s5384_s14 + $0x8] sm:$0xff] }
 0x43c   :  { %v2738_v37 = vmax.f32 %v2658_v3, %v3415_v15  ;;  %v2867_v31 = vrot.slane %v2866_v7, 2  ;;  %v2814_v12 = vrot.slane %v2737_v19, %v4082_v51  ;;  %v3733_v47 = vpack.c.bf16 %v3072_v20, %v3071_v21  ;;  %v3056_v3 = vld [vmem:[#allocation5 + $0x78] sm:$0xff]  ;;  %3732 = vmatpush3.bf16.msra.mxu0 %v3731_v60  ;;  %v3153_v52 = vld [vmem:[%s5384_s14 + $0x10] sm:$0xff]  ;;  %v3155_v19 = vld [vmem:[%s5384_s14 + $0x20] sm:$0xff] }
 0x43d   :  { %v2810_v1 = vrot.slane %v2736_v48, %v4082_v51  ;;  %v2874_v17 = vrot.slane %v2873_v14, 2  ;;  %v3735_v42 = vpack.c.bf16 %v3056_v3, %v3055_v27  ;;  %v3738_v11 = vpack.c.bf16 %v3152_v8, %v3151_v22  ;;  %v3157_v48 = vld [vmem:[%s5384_s14 + $0x30] sm:$0xff] }
 0x43e   :  { %v2818_v57 = vrot.slane %v2738_v37, %v4082_v51  ;;  %v2868_v61 = vadd.f32 %v2867_v31, %v2866_v7  ;;  %3734 = vmatprep.subr.bf16.mxu0 %v3733_v47  ;;  %v3741_v15 = vpack.c.bf16 %v3154_v24, %v3153_v52  ;;  %v3156_v7 = vld [vmem:[%s5384_s14 + $0x28] sm:$0xff]  ;;  %v3159_v31 = vld [vmem:[%s5384_s14 + $0x40] sm:$0xff] }
 0x43f   :  { %v2825_v2 = vsel %vm1391_vm1, %v2810_v1, %v2806_v36  ;;  %v2875_v18 = vadd.f32 %v2874_v17, %v2873_v14  ;;  %v3158_v14 = vld [vmem:[%s5384_s14 + $0x38] sm:$0xff]  ;;  %v3160_v36 = vld [vmem:[%s5384_s14 + $0x48] sm:$0xff]  ;;  %v3161_v17 = vld [vmem:[%s5384_s14 + $0x50] sm:$0xff] }
 0x440   :  { %v2826_v26 = vsel %vm1391_vm1, %v2818_v57, %v2814_v12  ;;  %v2869_v32 = vrot.slane %v2868_v61, 1  ;;  %v2878_v53 = vsel %vm2835_vm9, %v2825_v2, 0.0  ;;  %3736 = vmatpush3.bf16.msra.mxu0 %v3735_v42  ;;  %v3747_v37 = vpack.c.bf16 %v3158_v14, %v3157_v48  ;;  %v3162_v12 = vld [vmem:[%s5384_s14 + $0x58] sm:$0xff]  ;;  %v5445_v2 = vld [vmem:[#allocation11_spill] sm:$0xff] }
 0x441   :  { %v2876_v41 = vrot.slane %v2875_v18, 1  ;;  %v2879_v4 = vrot.slane %v2878_v53, 4  ;;  %v2885_v0 = vsel %vm2835_vm9, %v2826_v26, 0.0  ;;  %v3750_v1 = vpack.c.bf16 %v3160_v36, %v3159_v31 }
 0x442   :  { %v2870_v6 = vadd.f32 %v2869_v32, %v2868_v61  ;;  %v2886_v59 = vrot.slane %v2885_v0, 4  ;;  %v3753_v57 = vpack.c.bf16 %v3162_v12, %v3161_v17  ;;  %v2933_v61 = vld [vmem:[%s5381_s11] sm:$0x3]  ;;  %vm3855_vm1 = vmmov 0  }
 0x443   :  { %v2877_v38 = vadd.f32 %v2876_v41, %v2875_v18  ;;  %v2880_v49 = vadd.f32 %v2879_v4, %v2878_v53  ;;  %v2941_v18 = vsub.s32 1, %v5445_v2  ;;  %v2938_v26 = vrot.slane %v2933_v61, %v4082_v51  ;;  %v3165_v51 = vld [vmem:[%s5384_s14 + $0x70] sm:$0xff] }
 0x444   :  { %v2887_v13 = vadd.f32 %v2886_v59, %v2885_v0  ;;  %v2897_v10 = vmul.f32 0.5, %v2870_v6 }
 0x445   :  { %v2881_v56 = vrot.slane %v2880_v49, 2  ;;  %v2898_v55 = vmul.f32 0.5, %v2877_v38  ;;  %v2942_v32 = vrot.slane %v2933_v61, %v2941_v18  ;;  %v3163_v38 = vld [vmem:[%s5384_s14 + $0x60] sm:$0xff] }
 0x446   :  { %v2888_v25 = vrot.slane %v2887_v13, 2  ;;  %v2959_v35 = vrot.slane %v2897_v10, 4  ;;  %v3166_v10 = vld [vmem:[%s5384_s14 + $0x78] sm:$0xff] }
 0x447   :  { %v2882_v46 = vadd.f32 %v2881_v56, %v2880_v49  ;;  %v2961_v45 = vrot.slane %v2898_v55, 3  ;;  %v3164_v49 = vld [vmem:[%s5384_s14 + $0x68] sm:$0xff]  ;;  %v3759_v56 = vpack.c.bf16 %v3166_v10, %v3165_v51 }
 0x448   :  { %v2889_v43 = vadd.f32 %v2888_v25, %v2887_v13  ;;  %v2960_v63 = vsel %vm1284_vm5, %v2959_v35, %v2958_v34  ;;  %v3744_v34 = vpack.c.bf16 %v3156_v7, %v3155_v19  ;;  %v3756_v13 = vpack.c.bf16 %v3164_v49, %v3163_v38  ;;  %v3416_v25 = vld [vmem:[%s5383_s13] ss:$0 sm:$0xff] }
 0x449   :  { %v2883_v29 = vrot.slane %v2882_v46, 1  ;;  %v2962_v23 = vsel %vm1286_vm6, %v2961_v45, %v2960_v63  ;;  %v3417_v63 = vld [vmem:[%s5385_s15] ss:$0 sm:$0xff] }
 0x44a   :  { %v2890_v44 = vrot.slane %v2889_v43, 1 }
 0x44b   :  { %v2884_v39 = vadd.f32 %v2883_v29, %v2882_v46 }
 0x44c   :  { %v2891_v54 = vadd.f32 %v2890_v44, %v2889_v43 }
 0x44d   :  { %v2899_v33 = vmul.f32 0.5, %v2884_v39 }
 0x44e   :  { %v2900_v40 = vmul.f32 0.5, %v2891_v54 }
 0x44f   :  { %v2963_v9 = vrot.slane %v2899_v33, 2 }
 0x450   :  { %v2965_v16 = vrot.slane %v2900_v40, 1 }
 0x451   :  { %v2964_v28 = vsel %vm1288_vm7, %v2963_v9, %v2962_v23 }
 0x452   :  { %v2966_v58 = vsel %vm1290_vm8, %v2965_v16, %v2964_v28 }
 0x453   :  { %3033 = vmatmul.mubr.f32.vlgmr.msra.gmra.mrb[8].mxu1 %v2966_v58 }
 0x454   :  { %3739 = vmatpush3.bf16.msra.mxu1 %v3738_v11  ;;  %3604 = vmatprep.mubr.msk.f32.mxu1 %vm3855_vm1, %v3854_v62 }
 0x455   :  { %3740 = vmatprep.subr.bf16.mxu1 %v3853_v5 }
 0x458   :  { %3742 = vmatpush3.bf16.msra.mxu1 %v3741_v15 }
 0x459   :  { %3743 = vmatprep.subr.bf16.mxu1 %v3853_v5 }
 0x45c   :  { %3745 = vmatpush3.bf16.msra.mxu1 %v3744_v34 }
 0x45d   :  { %3746 = vmatprep.subr.bf16.mxu1 %v3853_v5 }
 0x460   :  { %3748 = vmatpush3.bf16.msra.mxu1 %v3747_v37 }
 0x461   :  { %3749 = vmatprep.subr.bf16.mxu1 %v3853_v5 }
 0x464   :  { %3751 = vmatpush3.bf16.msra.mxu1 %v3750_v1 }
 0x465   :  { %3752 = vmatprep.subr.bf16.mxu1 %v3853_v5 }
 0x468   :  { %3754 = vmatpush3.bf16.msra.mxu1 %v3753_v57 }
 0x469   :  { %3755 = vmatprep.subr.bf16.mxu1 %v3853_v5 }
 0x46c   :  { %3757 = vmatpush3.bf16.msra.mxu1 %v3756_v13 }
 0x46d   :  { %3758 = vmatprep.subr.bf16.mxu1 %v3853_v5 }
 0x470   :  { %3760 = vmatpush3.bf16.msra.mxu1 %v3759_v56 }
 0x526   :  { %v3034_v53 = vpop.f32.mrb[8].mxu1 }
 0x527   :  { %v3035_v41 = vadd.f32 %v3034_v53, %v2938_v26  ;;  %v3036_v4 = vpop.f32.mrb[9].mxu1 }
 0x528   :  { %v3037_v0 = vadd.f32 %v3036_v4, %v2942_v32 }
 0x529   :  { %v3039_v59 = vmax.f32 %v3035_v41, 0.0 }
 0x52a   :  { %v3040_v6 = vmax.f32 %v3037_v0, 0.0 }
 0x52c   :  { %3144 = vmatprep.mubr.f32.mxu0 %v3040_v6 }
 0x52d   :  { %3145 = vmatmul.mubr.f32.vlgmr.msra.gmra.mrb[24].mxu0 %v3039_v59 }
 0x600   :  { %v3488_v55 = vpop.f32.mrb[24].mxu0 }
 0x601   :  { %v3489_v35 = vpop.f32.mrb[25].mxu0 }
 0x602   :  { %v3490_v46 = vadd.f32 %v3489_v35, %v3488_v55 }
 0x604   :  { %v3147_v45 = vadd.f32 %v3490_v46, %v3416_v25 }
 0x606   :  { %v3150_v43 = vmax.f32 %v3147_v45, 0.0 }
 0x608   :  { %3605 = vmatmul.mubr.f32.vlgmr.msra.gmra.mrb[10].mxu1 %v3150_v43 }
 0x6db   :  { %v3240_v62 = vpop.f32.mrb[10].mxu1 }
 0x6dc   :  { %v3241_v29 = vadd.f32 %v3417_v63, %v3240_v62  ;;  %v3606_v5 = vpop.f32.mrb[11].mxu1 }
 0x6de   :  { %3244 = vst [vmem:[#allocation7] sm:$0xff] %v3241_v29 }
 0x6df   :  { %3828 = shalt.err (!%p3825_p6)
}
 0x6e0   :  { %s3829_s23 = scalar_lea.hbm %s5386_s16, 128 }
 0x6e1   :  { %p3830_p7 = scmp.ne.s32.totalorder %s5386_s16, %s3829_s23  ;;  %p3833_p8 = scmp.lt.u32.totalorder %s3829_s23, %s5386_s16 }
 0x6e3   :  { %p3835_p9 = pnand %p3833_p8, %p3830_p7 }
 0x6e5   :  { %3838 = shalt.err (!%p3835_p9)
}
 0x6e6   :  { %3254 = dma.vmem_to_hbm [thread:$0]  %s3252_s18, 128, %s5386_s16, [#allocation4]  }
 0x6e7   :  { %3843 = dma.done.wait [#allocation4], 128  }
 0x6e8   :  { %3844 = vsyncadd [#allocation4], 4294967168 }
 0x6e9   :  { %3258 = vsyncpa [#allocation3], 1 }
 0x6ea   :  { %3259 = vsyncpa [#allocation6], 1 }
 0x6eb   :  { %3260 = vsyncpa [#allocation4], 1 }

</bundles_post_ra>
